<compile_context>
chip_gen: v5e
topology: v5e:2x2
jax: 0.10.0
libtpu: 0.0.40
codegen_flags: <defaults>
</compile_context>

<pallas_src>
import math
import functools

import jax
import jax.numpy as jnp
from jax.experimental import pallas as pl
from jax.experimental.pallas import tpu as pltpu


LANE = 128  # pad all feature dims to multiples of the 128-lane vreg width


def _round_up(n, m):
    return ((n + m - 1) // m) * m


# ----------------------------------------------------------------------------
# Kernel
# ----------------------------------------------------------------------------
def autoencoder_kernel(x_ref,
                       w1_ref, b1_ref, w2_ref, b2_ref, w3_ref, b3_ref,
                       w4_ref, b4_ref, w5_ref, b5_ref, w6_ref, b6_ref,
                       out_ref):
    """Fused forward: 5x (matmul + bias + ReLU) + (matmul + bias + sigmoid).

    One grid step processes a (TB, in_p) tile of the batch. All weights fit in
    VMEM and are resident across grid steps (constant index_map). The input is
    cast to bf16 in-kernel (no separate XLA cast pass); accumulation and the
    elementwise epilogue stay f32; the output is stored bf16.
    """
    h = x_ref[...].astype(jnp.bfloat16)  # (TB, in_p)

    def linear_relu(h, w_ref, b_ref):
        y = jnp.dot(h, w_ref[...], preferred_element_type=jnp.float32) + b_ref[...]
        return jnp.maximum(y, 0.0).astype(jnp.bfloat16)

    # encoder
    h = linear_relu(h, w1_ref, b1_ref)   # in_p  -> q3_p
    h = linear_relu(h, w2_ref, b2_ref)   # q3_p  -> mid_p
    h = linear_relu(h, w3_ref, b3_ref)   # mid_p -> q1_p
    h = linear_relu(h, w4_ref, b4_ref)   # q1_p  -> h_p
    # decoder
    h = linear_relu(h, w5_ref, b5_ref)   # h_p   -> mid_p
    y = jnp.dot(h, w6_ref[...], preferred_element_type=jnp.float32) + b6_ref[...]
    out_ref[...] = jax.nn.sigmoid(y).astype(out_ref.dtype)   # mid_p -> in_p, bf16


# ----------------------------------------------------------------------------
# Wrapper
# ----------------------------------------------------------------------------
def layer_dims_for(in_dim, h_dim):
    mid_dim = int(math.sqrt(h_dim * in_dim))
    q1_dim = int(math.sqrt(h_dim * mid_dim))
    q3_dim = int(math.sqrt(mid_dim * in_dim))
    return [(in_dim, q3_dim), (q3_dim, mid_dim), (mid_dim, q1_dim),
            (q1_dim, h_dim), (h_dim, mid_dim), (mid_dim, in_dim)]


def pad_params(params):
    """Zero-pad each (in,out) weight / (1,out) bias to lane multiples.

    Weights are cast to bf16 (matmul operands), biases stay f32 (added to the
    f32 accumulator). Zero fill keeps the math exact through the ReLU layers;
    padded sigmoid(0)=0.5 output columns are discarded in the wrapper.
    """
    padded = []
    for i in range(6):
        w, b = params[2 * i], params[2 * i + 1]
        fi, fo = w.shape
        fi_p, fo_p = _round_up(fi, LANE), _round_up(fo, LANE)
        w_p = jnp.zeros((fi_p, fo_p), jnp.float32).at[:fi, :fo].set(w)
        b_p = jnp.zeros((1, fo_p), jnp.float32).at[:, :fo].set(b)
        padded.extend([w_p.astype(jnp.bfloat16), b_p])
    return tuple(padded)


@functools.partial(jax.jit, static_argnames=("block_batch",))
def autoencoder_forward(x, padded_params, *, block_batch=1024):
    """x: (batch, in_dim) f32 (or bf16). padded_params: output of pad_params().

    Returns a bf16 (batch, in_dim) reconstruction.

    Tile selection: tb = min(block_batch, VMEM cap, batch), multiple of 8, and
    the grid is kept at >= 2 steps when the batch allows so v7x's second
    TensorCore gets work. The VMEM cap keeps the double-buffered input/output
    tiles (plus ~0.5 MiB of resident weights) comfortably under every
    generation's default scoped-VMEM limit.
    """
    batch, in_dim = x.shape
    in_p = padded_params[0].shape[0]           # padded input width (lane multiple)

    # ---- batch tile selection -------------------------------------------------
    batch8 = _round_up(batch, 8)
    # Double-buffered per-step tiles: input (x dtype) + output (bf16).
    bytes_per_row = in_p * (x.dtype.itemsize + 2) * 2
    vmem_tile_budget = 12 * 1024 * 1024        # leave headroom under 16/32 MiB scoped
    tb_cap = max(8, (vmem_tile_budget // bytes_per_row) // 8 * 8)
    tb = max(8, (min(block_batch, tb_cap, batch8) // 8) * 8)
    num_tiles = pl.cdiv(batch8, tb)
    if num_tiles < 2 and batch8 >= 16:
        # keep >= 2 grid steps so the "parallel" axis can shard across v7x's 2 TCs
        num_tiles = 2
        tb = _round_up(pl.cdiv(batch8, num_tiles), 8)
        num_tiles = pl.cdiv(batch8, tb)
    batch_p = tb * num_tiles

    # ---- input: avoid any wrapper-side pad/cast pass when already aligned ------
    needs_pad = (batch_p != batch) or (in_p != in_dim)
    if needs_pad:
        x_in = jnp.zeros((batch_p, in_p), x.dtype).at[:batch, :in_dim].set(x)
    else:
        x_in = x                               # no extra HBM pass; cast happens in-kernel

    grid = (num_tiles,)
    x_spec = pl.BlockSpec((tb, in_p), lambda i: (i, 0))
    out_spec = pl.BlockSpec((tb, in_p), lambda i: (i, 0))
    # Constant block index -> weights/biases stay VMEM-resident across steps.
    param_specs = [pl.BlockSpec(p.shape, lambda i: (0, 0)) for p in padded_params]

    # ---- advisory cost estimate for the XLA scheduler ---------------------------
    flops = 2 * batch_p * sum(padded_params[2 * i].shape[0] * padded_params[2 * i].shape[1]
                              for i in range(6))
    param_bytes = sum(int(p.size) * p.dtype.itemsize for p in padded_params)
    bytes_accessed = (int(x_in.size) * x_in.dtype.itemsize   # input read
                      + batch_p * in_p * 2                   # bf16 output write
                      + param_bytes)
    cost = pl.CostEstimate(flops=flops,
                           transcendentals=batch_p * in_p,   # sigmoid
                           bytes_accessed=bytes_accessed)

    out_p = pl.pallas_call(
        autoencoder_kernel,
        out_shape=jax.ShapeDtypeStruct((batch_p, in_p), jnp.bfloat16),
        grid=grid,
        in_specs=[x_spec] + param_specs,
        out_specs=out_spec,
        cost_estimate=cost,
        compiler_params=pltpu.CompilerParams(
            # Batch tiles are independent: parallel lets Mosaic shard grid
            # steps across both TensorCores on v7x (no-op on v5e/v6e).
            dimension_semantics=("parallel",),
        ),
    )(x_in, *padded_params)

    # Only slice (an extra output-sized HBM pass) when padding was actually needed.
    if needs_pad:
        return out_p[:batch, :in_dim]
    return out_p


# ----------------------------------------------------------------------------
# Init + references
# ----------------------------------------------------------------------------
def init_params(key, in_dim, h_dim):
    """Mimic PyTorch nn.Linear default init (uniform +/- 1/sqrt(fan_in))."""
    layer_dims = layer_dims_for(in_dim, h_dim)
    params = []
    keys = jax.random.split(key, 2 * len(layer_dims))
    for i, (fan_in, fan_out) in enumerate(layer_dims):
        bound = 1.0 / math.sqrt(fan_in)
        w = jax.random.uniform(keys[2 * i], (fan_in, fan_out),
                               minval=-bound, maxval=bound, dtype=jnp.float32)
        b = jax.random.uniform(keys[2 * i + 1], (1, fan_out),
                               minval=-bound, maxval=bound, dtype=jnp.float32)
        params.extend([w, b])
    return tuple(params), layer_dims


def reference_forward_f32(x, params):
    """Pure-f32 JAX reference of the original module (semantics check)."""
    h = x
    for i in range(5):
        w, b = params[2 * i], params[2 * i + 1]
        h = jnp.maximum(h @ w + b, 0.0)
    w, b = params[10], params[11]
    return jax.nn.sigmoid(h @ w + b)


def reference_forward_bf16(x, padded_params, in_dim):
    """JAX reference using the same padding + bf16 matmul inputs as the kernel."""
    batch = x.shape[0]
    in_p = padded_params[0].shape[0]
    h = (jnp.zeros((batch, in_p), jnp.float32)
         .at[:, :in_dim].set(x).astype(jnp.bfloat16))
    for i in range(5):
        w, b = padded_params[2 * i], padded_params[2 * i + 1]
        y = jnp.dot(h, w, preferred_element_type=jnp.float32) + b
        h = jnp.maximum(y, 0.0).astype(jnp.bfloat16)
    w, b = padded_params[10], padded_params[11]
    y = jnp.dot(h, w, preferred_element_type=jnp.float32) + b
    return jax.nn.sigmoid(y)[:, :in_dim]


# ----------------------------------------------------------------------------
if __name__ == "__main__":
    # Small shapes consistent with the module's dimension formulas:
    #   in_dim=256, h_dim=64 -> mid=128, q1=90, q3=181 (padded to 128/128/256)
    # batch=256 exercises the aligned fast path (no wrapper pad/cast/slice) and
    # yields a 2-step grid (both v7x cores busy).
    batch = 256
    in_dim = 256
    h_dim = 64

    key = jax.random.PRNGKey(0)
    pkey, xkey = jax.random.split(key)
    params, layer_dims = init_params(pkey, in_dim, h_dim)
    padded_params = pad_params(params)

    x = jax.random.uniform(xkey, (batch, in_dim), dtype=jnp.float32)

    out = autoencoder_forward(x, padded_params)
    out = jax.block_until_ready(out)
    assert out.shape == (batch, in_dim)
    assert out.dtype == jnp.bfloat16

    out_f32 = out.astype(jnp.float32)

    # Check vs a JAX reference doing the identical bf16-input math
    # (only difference: kernel output is rounded to bf16, sigmoid in [0,1]).
    ref_bf16 = reference_forward_bf16(x, padded_params, in_dim)
    assert jnp.max(jnp.abs(out_f32 - ref_bf16)) < 1e-2, \
        "mismatch vs bf16-matched JAX reference"

    # Loose check vs the pure-f32 original-module reference (bf16 matmul inputs
    # + bf16 output rounding introduce small, bounded error on a [0,1] sigmoid).
    ref_f32 = reference_forward_f32(x, params)
    assert jnp.max(jnp.abs(out_f32 - ref_f32)) < 4e-2, \
        "mismatch vs f32 module reference"

    print("KERNEL_OK")
</pallas_src>

<mosaic_0001>
module attributes {stable_mosaic.version = 11 : i64} {
  func.func @autoencoder_kernel(%arg0: i32, %arg1: memref<128x256xf32, #tpu.memory_space<vmem>>, %arg2: memref<256x256xbf16, #tpu.memory_space<vmem>>, %arg3: memref<1x256xf32, #tpu.memory_space<vmem>>, %arg4: memref<256x128xbf16, #tpu.memory_space<vmem>>, %arg5: memref<1x128xf32, #tpu.memory_space<vmem>>, %arg6: memref<128x128xbf16, #tpu.memory_space<vmem>>, %arg7: memref<1x128xf32, #tpu.memory_space<vmem>>, %arg8: memref<128x128xbf16, #tpu.memory_space<vmem>>, %arg9: memref<1x128xf32, #tpu.memory_space<vmem>>, %arg10: memref<128x128xbf16, #tpu.memory_space<vmem>>, %arg11: memref<1x128xf32, #tpu.memory_space<vmem>>, %arg12: memref<128x256xbf16, #tpu.memory_space<vmem>>, %arg13: memref<1x256xf32, #tpu.memory_space<vmem>>, %arg14: memref<128x256xbf16, #tpu.memory_space<vmem>>) attributes {dimension_semantics = [#tpu.dimension_semantics<parallel>], iteration_bounds = array<i64: 2>, scalar_prefetch = 0 : i64, scratch_operands = 0 : i64, tpu.core_type = #tpu.core_type<tc>, window_params = [{transform_indices = @transform_0, window_bounds = array<i64: 128, 256>}, {pipeline_mode = #tpu.pipeline_mode<synchronous>, transform_indices = @transform_1, window_bounds = array<i64: 256, 256>}, {pipeline_mode = #tpu.pipeline_mode<synchronous>, transform_indices = @transform_2, window_bounds = array<i64: 1, 256>}, {pipeline_mode = #tpu.pipeline_mode<synchronous>, transform_indices = @transform_3, window_bounds = array<i64: 256, 128>}, {pipeline_mode = #tpu.pipeline_mode<synchronous>, transform_indices = @transform_4, window_bounds = array<i64: 1, 128>}, {pipeline_mode = #tpu.pipeline_mode<synchronous>, transform_indices = @transform_5, window_bounds = array<i64: 128, 128>}, {pipeline_mode = #tpu.pipeline_mode<synchronous>, transform_indices = @transform_6, window_bounds = array<i64: 1, 128>}, {pipeline_mode = #tpu.pipeline_mode<synchronous>, transform_indices = @transform_7, window_bounds = array<i64: 128, 128>}, {pipeline_mode = #tpu.pipeline_mode<synchronous>, transform_indices = @transform_8, window_bounds = array<i64: 1, 128>}, {pipeline_mode = #tpu.pipeline_mode<synchronous>, transform_indices = @transform_9, window_bounds = array<i64: 128, 128>}, {pipeline_mode = #tpu.pipeline_mode<synchronous>, transform_indices = @transform_10, window_bounds = array<i64: 1, 128>}, {pipeline_mode = #tpu.pipeline_mode<synchronous>, transform_indices = @transform_11, window_bounds = array<i64: 128, 256>}, {pipeline_mode = #tpu.pipeline_mode<synchronous>, transform_indices = @transform_12, window_bounds = array<i64: 1, 256>}, {transform_indices = @transform_13, window_bounds = array<i64: 128, 256>}]} {
    %c0 = arith.constant 0 : index
    %c0_0 = arith.constant 0 : index
    %0 = vector.load %arg1[%c0, %c0_0] : memref<128x256xf32, #tpu.memory_space<vmem>>, vector<128x256xf32>
    %1 = arith.truncf %0 : vector<128x256xf32> to vector<128x256xbf16>
    %c0_1 = arith.constant 0 : index
    %c0_2 = arith.constant 0 : index
    %2 = vector.load %arg2[%c0_1, %c0_2] : memref<256x256xbf16, #tpu.memory_space<vmem>>, vector<256x256xbf16>
    %cst = arith.constant dense<0.000000e+00> : vector<128x256xf32>
    %3 = tpu.matmul %1, %2, %cst {dimension_numbers = #tpu.dot_dimension_numbers<[1], [0], [0], [1], [0, 0, 1, 1], [], []>} : vector<128x256xbf16>, vector<256x256xbf16>, vector<128x256xf32> -> vector<128x256xf32>
    %c0_3 = arith.constant 0 : index
    %c0_4 = arith.constant 0 : index
    %4 = vector.load %arg3[%c0_3, %c0_4] : memref<1x256xf32, #tpu.memory_space<vmem>>, vector<1x256xf32>
    %5 = vector.broadcast %4 : vector<1x256xf32> to vector<128x256xf32>
    %6 = arith.addf %3, %5 : vector<128x256xf32>
    %cst_5 = arith.constant 0.000000e+00 : f32
    %7 = vector.broadcast %cst_5 : f32 to vector<128x256xf32>
    %8 = arith.maximumf %6, %7 : vector<128x256xf32>
    %9 = arith.truncf %8 : vector<128x256xf32> to vector<128x256xbf16>
    %c0_6 = arith.constant 0 : index
    %c0_7 = arith.constant 0 : index
    %10 = vector.load %arg4[%c0_6, %c0_7] : memref<256x128xbf16, #tpu.memory_space<vmem>>, vector<256x128xbf16>
    %cst_8 = arith.constant dense<0.000000e+00> : vector<128x128xf32>
    %11 = tpu.matmul %9, %10, %cst_8 {dimension_numbers = #tpu.dot_dimension_numbers<[1], [0], [0], [1], [0, 0, 1, 1], [], []>} : vector<128x256xbf16>, vector<256x128xbf16>, vector<128x128xf32> -> vector<128x128xf32>
    %c0_9 = arith.constant 0 : index
    %c0_10 = arith.constant 0 : index
    %12 = vector.load %arg5[%c0_9, %c0_10] : memref<1x128xf32, #tpu.memory_space<vmem>>, vector<1x128xf32>
    %13 = vector.broadcast %12 : vector<1x128xf32> to vector<128x128xf32>
    %14 = arith.addf %11, %13 : vector<128x128xf32>
    %cst_11 = arith.constant 0.000000e+00 : f32
    %15 = vector.broadcast %cst_11 : f32 to vector<128x128xf32>
    %16 = arith.maximumf %14, %15 : vector<128x128xf32>
    %17 = arith.truncf %16 : vector<128x128xf32> to vector<128x128xbf16>
    %c0_12 = arith.constant 0 : index
    %c0_13 = arith.constant 0 : index
    %18 = vector.load %arg6[%c0_12, %c0_13] : memref<128x128xbf16, #tpu.memory_space<vmem>>, vector<128x128xbf16>
    %cst_14 = arith.constant dense<0.000000e+00> : vector<128x128xf32>
    %19 = tpu.matmul %17, %18, %cst_14 {dimension_numbers = #tpu.dot_dimension_numbers<[1], [0], [0], [1], [0, 0, 1, 1], [], []>} : vector<128x128xbf16>, vector<128x128xbf16>, vector<128x128xf32> -> vector<128x128xf32>
    %c0_15 = arith.constant 0 : index
    %c0_16 = arith.constant 0 : index
    %20 = vector.load %arg7[%c0_15, %c0_16] : memref<1x128xf32, #tpu.memory_space<vmem>>, vector<1x128xf32>
    %21 = vector.broadcast %20 : vector<1x128xf32> to vector<128x128xf32>
    %22 = arith.addf %19, %21 : vector<128x128xf32>
    %cst_17 = arith.constant 0.000000e+00 : f32
    %23 = vector.broadcast %cst_17 : f32 to vector<128x128xf32>
    %24 = arith.maximumf %22, %23 : vector<128x128xf32>
    %25 = arith.truncf %24 : vector<128x128xf32> to vector<128x128xbf16>
    %c0_18 = arith.constant 0 : index
    %c0_19 = arith.constant 0 : index
    %26 = vector.load %arg8[%c0_18, %c0_19] : memref<128x128xbf16, #tpu.memory_space<vmem>>, vector<128x128xbf16>
    %cst_20 = arith.constant dense<0.000000e+00> : vector<128x128xf32>
    %27 = tpu.matmul %25, %26, %cst_20 {dimension_numbers = #tpu.dot_dimension_numbers<[1], [0], [0], [1], [0, 0, 1, 1], [], []>} : vector<128x128xbf16>, vector<128x128xbf16>, vector<128x128xf32> -> vector<128x128xf32>
    %c0_21 = arith.constant 0 : index
    %c0_22 = arith.constant 0 : index
    %28 = vector.load %arg9[%c0_21, %c0_22] : memref<1x128xf32, #tpu.memory_space<vmem>>, vector<1x128xf32>
    %29 = vector.broadcast %28 : vector<1x128xf32> to vector<128x128xf32>
    %30 = arith.addf %27, %29 : vector<128x128xf32>
    %cst_23 = arith.constant 0.000000e+00 : f32
    %31 = vector.broadcast %cst_23 : f32 to vector<128x128xf32>
    %32 = arith.maximumf %30, %31 : vector<128x128xf32>
    %33 = arith.truncf %32 : vector<128x128xf32> to vector<128x128xbf16>
    %c0_24 = arith.constant 0 : index
    %c0_25 = arith.constant 0 : index
    %34 = vector.load %arg10[%c0_24, %c0_25] : memref<128x128xbf16, #tpu.memory_space<vmem>>, vector<128x128xbf16>
    %cst_26 = arith.constant dense<0.000000e+00> : vector<128x128xf32>
    %35 = tpu.matmul %33, %34, %cst_26 {dimension_numbers = #tpu.dot_dimension_numbers<[1], [0], [0], [1], [0, 0, 1, 1], [], []>} : vector<128x128xbf16>, vector<128x128xbf16>, vector<128x128xf32> -> vector<128x128xf32>
    %c0_27 = arith.constant 0 : index
    %c0_28 = arith.constant 0 : index
    %36 = vector.load %arg11[%c0_27, %c0_28] : memref<1x128xf32, #tpu.memory_space<vmem>>, vector<1x128xf32>
    %37 = vector.broadcast %36 : vector<1x128xf32> to vector<128x128xf32>
    %38 = arith.addf %35, %37 : vector<128x128xf32>
    %cst_29 = arith.constant 0.000000e+00 : f32
    %39 = vector.broadcast %cst_29 : f32 to vector<128x128xf32>
    %40 = arith.maximumf %38, %39 : vector<128x128xf32>
    %41 = arith.truncf %40 : vector<128x128xf32> to vector<128x128xbf16>
    %c0_30 = arith.constant 0 : index
    %c0_31 = arith.constant 0 : index
    %42 = vector.load %arg12[%c0_30, %c0_31] : memref<128x256xbf16, #tpu.memory_space<vmem>>, vector<128x256xbf16>
    %cst_32 = arith.constant dense<0.000000e+00> : vector<128x256xf32>
    %43 = tpu.matmul %41, %42, %cst_32 {dimension_numbers = #tpu.dot_dimension_numbers<[1], [0], [0], [1], [0, 0, 1, 1], [], []>} : vector<128x128xbf16>, vector<128x256xbf16>, vector<128x256xf32> -> vector<128x256xf32>
    %c0_33 = arith.constant 0 : index
    %c0_34 = arith.constant 0 : index
    %44 = vector.load %arg13[%c0_33, %c0_34] : memref<1x256xf32, #tpu.memory_space<vmem>>, vector<1x256xf32>
    %45 = vector.broadcast %44 : vector<1x256xf32> to vector<128x256xf32>
    %46 = arith.addf %43, %45 : vector<128x256xf32>
    %47 = arith.negf %46 : vector<128x256xf32>
    %48 = math.exp %47 : vector<128x256xf32>
    %cst_35 = arith.constant 1.000000e+00 : f32
    %49 = vector.broadcast %cst_35 : f32 to vector<128x256xf32>
    %50 = arith.addf %49, %48 : vector<128x256xf32>
    %51 = arith.divf %49, %50 : vector<128x256xf32>
    %52 = arith.truncf %51 : vector<128x256xf32> to vector<128x256xbf16>
    %c0_36 = arith.constant 0 : index
    %c0_37 = arith.constant 0 : index
    %53 = vector.load %arg14[%c0_36, %c0_37] : memref<128x256xbf16, #tpu.memory_space<vmem>>, vector<128x256xbf16>
    tpu.vector_store %arg14[%c0_36, %c0_37], %52 {strides = array<i32>} : memref<128x256xbf16, #tpu.memory_space<vmem>>, vector<128x256xbf16>,
    return
  }
  func.func @transform_0(%arg0: i32) -> (i32, i32) {
    %c0_i32 = arith.constant 0 : i32
    %c0_i32_0 = arith.constant 0 : i32
    return %arg0, %c0_i32 : i32, i32
  }
  func.func @transform_1(%arg0: i32) -> (i32, i32) {
    %c0_i32 = arith.constant 0 : i32
    %c0_i32_0 = arith.constant 0 : i32
    %c0_i32_1 = arith.constant 0 : i32
    return %c0_i32, %c0_i32_0 : i32, i32
  }
  func.func @transform_2(%arg0: i32) -> (i32, i32) {
    %c0_i32 = arith.constant 0 : i32
    %c0_i32_0 = arith.constant 0 : i32
    %c0_i32_1 = arith.constant 0 : i32
    return %c0_i32, %c0_i32_0 : i32, i32
  }
  func.func @transform_3(%arg0: i32) -> (i32, i32) {
    %c0_i32 = arith.constant 0 : i32
    %c0_i32_0 = arith.constant 0 : i32
    %c0_i32_1 = arith.constant 0 : i32
    return %c0_i32, %c0_i32_0 : i32, i32
  }
  func.func @transform_4(%arg0: i32) -> (i32, i32) {
    %c0_i32 = arith.constant 0 : i32
    %c0_i32_0 = arith.constant 0 : i32
    %c0_i32_1 = arith.constant 0 : i32
    return %c0_i32, %c0_i32_0 : i32, i32
  }
  func.func @transform_5(%arg0: i32) -> (i32, i32) {
    %c0_i32 = arith.constant 0 : i32
    %c0_i32_0 = arith.constant 0 : i32
    %c0_i32_1 = arith.constant 0 : i32
    return %c0_i32, %c0_i32_0 : i32, i32
  }
  func.func @transform_6(%arg0: i32) -> (i32, i32) {
    %c0_i32 = arith.constant 0 : i32
    %c0_i32_0 = arith.constant 0 : i32
    %c0_i32_1 = arith.constant 0 : i32
    return %c0_i32, %c0_i32_0 : i32, i32
  }
  func.func @transform_7(%arg0: i32) -> (i32, i32) {
    %c0_i32 = arith.constant 0 : i32
    %c0_i32_0 = arith.constant 0 : i32
    %c0_i32_1 = arith.constant 0 : i32
    return %c0_i32, %c0_i32_0 : i32, i32
  }
  func.func @transform_8(%arg0: i32) -> (i32, i32) {
    %c0_i32 = arith.constant 0 : i32
    %c0_i32_0 = arith.constant 0 : i32
    %c0_i32_1 = arith.constant 0 : i32
    return %c0_i32, %c0_i32_0 : i32, i32
  }
  func.func @transform_9(%arg0: i32) -> (i32, i32) {
    %c0_i32 = arith.constant 0 : i32
    %c0_i32_0 = arith.constant 0 : i32
    %c0_i32_1 = arith.constant 0 : i32
    return %c0_i32, %c0_i32_0 : i32, i32
  }
  func.func @transform_10(%arg0: i32) -> (i32, i32) {
    %c0_i32 = arith.constant 0 : i32
    %c0_i32_0 = arith.constant 0 : i32
    %c0_i32_1 = arith.constant 0 : i32
    return %c0_i32, %c0_i32_0 : i32, i32
  }
  func.func @transform_11(%arg0: i32) -> (i32, i32) {
    %c0_i32 = arith.constant 0 : i32
    %c0_i32_0 = arith.constant 0 : i32
    %c0_i32_1 = arith.constant 0 : i32
    return %c0_i32, %c0_i32_0 : i32, i32
  }
  func.func @transform_12(%arg0: i32) -> (i32, i32) {
    %c0_i32 = arith.constant 0 : i32
    %c0_i32_0 = arith.constant 0 : i32
    %c0_i32_1 = arith.constant 0 : i32
    return %c0_i32, %c0_i32_0 : i32, i32
  }
  func.func @transform_13(%arg0: i32) -> (i32, i32) {
    %c0_i32 = arith.constant 0 : i32
    %c0_i32_0 = arith.constant 0 : i32
    return %arg0, %c0_i32 : i32, i32
  }
}

</mosaic_0001>

<bundles_post_ra>
// kernel: autoencoder_forward.1
= control target key start
LH: loop header
LB: loop body
LE: loop exit
PB: predicated region body
PF: predicated region fallthrough
CT: control target
= control target key end

     0   :  { %s4966_s0 = inlined_call_operand.hbm [shape: f32[256,256], index: 0, kind: input, shape index: {}]   ;;  %s4967_s1 = inlined_call_operand.hbm [shape: bf16[256,256], index: 1, kind: input, shape index: {}]   ;;  %s4968_s2 = inlined_call_operand.hbm [shape: f32[1,256], index: 2, kind: input, shape index: {}]   ;;  %s4969_s3 = inlined_call_operand.hbm [shape: bf16[256,128], index: 3, kind: input, shape index: {}]   ;;  %s4970_s4 = inlined_call_operand.vmem [shape: f32[1,128], index: 4, kind: input, shape index: {}]   ;;  %s4971_s5 = inlined_call_operand.hbm [shape: bf16[128,128], index: 5, kind: input, shape index: {}]   ;;  %s4972_s6 = inlined_call_operand.vmem [shape: f32[1,128], index: 6, kind: input, shape index: {}]   ;;  %s4973_s7 = inlined_call_operand.hbm [shape: bf16[128,128], index: 7, kind: input, shape index: {}]   ;;  %s4974_s8 = inlined_call_operand.vmem [shape: f32[1,128], index: 8, kind: input, shape index: {}]   ;;  %s4975_s9 = inlined_call_operand.hbm [shape: bf16[128,128], index: 9, kind: input, shape index: {}]   ;;  %s4976_s10 = inlined_call_operand.vmem [shape: f32[1,128], index: 10, kind: input, shape index: {}]   ;;  %s4977_s11 = inlined_call_operand.hbm [shape: bf16[128,256], index: 11, kind: input, shape index: {}]   ;;  %s4978_s12 = inlined_call_operand.vmem [shape: f32[1,256], index: 12, kind: input, shape index: {}]   ;;  %s4979_s13 = inlined_call_operand.hbm [shape: bf16[256,256], index: 13, kind: output, shape index: {}]  }
   0x1   :  { %4983 = sst [smem:[#allocation23_spill]] %s4967_s1 }
   0x2   :  { %4984 = sst [smem:[#allocation24_spill]] %s4968_s2 }
   0x3   :  { %4985 = sst [smem:[#allocation25_spill]] %s4969_s3 }
   0x4   :  { %4986 = sst [smem:[#allocation26_spill]] %s4971_s5 }
   0x5   :  { %4987 = sst [smem:[#allocation27_spill]] %s4973_s7 }
   0x6   :  { %4988 = sst [smem:[#allocation28_spill]] %s4975_s9 }
   0x7   :  { %4989 = sst [smem:[#allocation29_spill]] %s4978_s12 }
   0x8   :  { %4990 = sst [smem:[#allocation30_spill]] %s4979_s13 }
   0x9   :  { %18 = vsyncpa [#allocation3], 0 }
   0xa   :  { %20 = vsyncpa [#allocation3 + $0x1], 0 }
   0xb   :  { %21 = vsyncpa [#allocation6], 0 }
   0xc   :  { %22 = vsyncpa [#allocation9], 0 }
   0xd   :  { %23 = vsyncpa [#allocation12], 0 }
   0xe   :  { %24 = vsyncpa [#allocation15], 0 }
   0xf   :  { %25 = vsyncpa [#allocation4], 0 }
  0x10   :  { %27 = vsyncpa [#allocation4 + $0x1], 0  ;;  %s3938_s25 = smov 0   ;;  %s3940_s26 = smov 0  }
  0x11   :  { %s3942_s27 = smov 0   ;;  %s3944_s28 = smov 0  }
  0x12 LB: > { %s4991_s1 = sld [smem:[#allocation23_spill]]  ;;  %s3962_s15 = sadd.s32 4294967295, %s3851_s28   ;;  %s3851_s28 = sphi %s3944_s28, %s5078_s28   ;;  %s3847_s27 = sphi %s3942_s27, %s5077_s27   ;;  %s3843_s26 = sphi %s3940_s26, %s5076_s26   ;;  %s3839_s25 = sphi %s3938_s25, %s5075_s25  }
  0x13   : > { %p2743_p0 = scmp.ge.s32.totalorder %s3851_s28, 1  ;;  %p54_p1 = scmp.eq.s32.totalorder %s3962_s15, 0 }
  0x14   : > { %p342_p2 = scmp.lt.s32.totalorder %s3851_s28, 3  ;;  %s3853_s17 = smov [#allocation5]  }
  0x15   : > { %s355_s18 = sshll.u32 %s3853_s17, 4  ;;  %s4993_s3 = sld [smem:[#allocation25_spill]]  ;;  %s356_s18 = int_to_ptr.vmem [resolvable:$true] %s355_s18 }
  0x16   : > { %p3967_p3 = pnand %p2743_p0, %p342_p2  ;;  %s3854_s23 = smov [#allocation8]  }
  0x17   : > { %s381_s24 = sshll.u32 %s3854_s23, 4  ;;  %s4981_s29 = smov 128   ;;  %s382_s24 = int_to_ptr.vmem [resolvable:$true] %s381_s24 }
  0x18   : > { %s353_s14 = sshll.u32 %s4991_s1, 4  ;;  %p3304_p4 = pneg %p3967_p3  ;;  %s354_s14 = int_to_ptr.hbm [resolvable:$true] %s353_s14 }
  0x19   : > { %s4982_s30 = smov 8   ;;  %s3857_s17 = smov 64  }
  0x1a   : > { %p3979_p6 = pnand %p3304_p4, %p54_p1  ;;  %s3858_s19 = smov 4  }
  0x1b   : > { %s379_s21 = sshll.u32 %s4993_s3, 4  ;;  %s4995_s7 = sld [smem:[#allocation27_spill]]  ;;  %s380_s21 = int_to_ptr.hbm [resolvable:$true] %s379_s21 }
  0x1c   : > { %3307 = dma.hbm_to_vmem [thread:$0]  (!%p3979_p6), %s354_s14, 4096, %s356_s18, [#allocation6], %s4981_s29, %s4981_s29, %s4982_s30  }
  0x1d   : > { %3313 = dma.hbm_to_vmem [thread:$0]  (!%p3979_p6), %s380_s21, 2048, %s382_s24, [#allocation9], %s3857_s17, %s3857_s17, %s3858_s19  }
  0x1e   : > { %s3859_s3 = smov [#allocation11]   ;;  %s4996_s2 = sld [smem:[#allocation24_spill]] }
  0x1f   : > { %s415_s13 = sshll.u32 %s3859_s3, 4  ;;  %s3860_s21 = smov [#allocation7]   ;;  %s416_s13 = int_to_ptr.vmem [resolvable:$true] %s415_s13 }
  0x20   : > { %s370_s24 = sshll.u32 %s3860_s21, 4  ;;  %s4997_s5 = sld [smem:[#allocation26_spill]]  ;;  %s371_s24 = int_to_ptr.vmem [resolvable:$true] %s370_s24 }
  0x21   : > { %s413_s23 = sshll.u32 %s4995_s7, 4  ;;  %s4998_s9 = sld [smem:[#allocation28_spill]]  ;;  %s414_s23 = int_to_ptr.hbm [resolvable:$true] %s413_s23 }
  0x22   : > { %3319 = dma.hbm_to_vmem [thread:$0]  (!%p3979_p6), %s414_s23, 1024, %s416_s13, [#allocation12], %s3857_s17, %s3857_s17, %s3858_s19  }
  0x23   : > { %s3861_s30 = smov [#allocation10]   ;;  %s3862_s29 = smov [#allocation13]  }
  0x24   : > { %s368_s18 = sshll.u32 %s4996_s2, 4  ;;  %s398_s13 = sshll.u32 %s3861_s30, 4  ;;  %s369_s18 = int_to_ptr.hbm [resolvable:$true] %s368_s18  ;;  %s399_s13 = int_to_ptr.vmem [resolvable:$true] %s398_s13 }
  0x25   : > { %3310 = dma.hbm_to_vmem [thread:$0]  (!%p3979_p6), %s369_s18, 32, %s371_s24, [#allocation6]  }
  0x26   : > { %s396_s20 = sshll.u32 %s4997_s5, 4  ;;  %s432_s23 = sshll.u32 %s3862_s29, 4  ;;  %s397_s20 = int_to_ptr.hbm [resolvable:$true] %s396_s20  ;;  %s433_s23 = int_to_ptr.vmem [resolvable:$true] %s432_s23 }
  0x27   : > { %s430_s14 = sshll.u32 %s4998_s9, 4  ;;  %s447_s30 = sshll.u32 %s4977_s11, 4  ;;  %s431_s14 = int_to_ptr.hbm [resolvable:$true] %s430_s14  ;;  %s448_s30 = int_to_ptr.hbm [resolvable:$true] %s447_s30 }
  0x28   : > { %3316 = dma.hbm_to_vmem [thread:$0]  (!%p3979_p6), %s397_s20, 1024, %s399_s13, [#allocation9], %s3857_s17, %s3857_s17, %s3858_s19  }
  0x29   : > { %3322 = dma.hbm_to_vmem [thread:$0]  (!%p3979_p6), %s431_s14, 1024, %s433_s23, [#allocation12], %s3857_s17, %s3857_s17, %s3858_s19  }
  0x2a   : > { %s3863_s24 = smov [#allocation14]   ;;  %s4999_s20 = smov 8  }
  0x2b   : > { %s449_s1 = sshll.u32 %s3863_s24, 4  ;;  %s5000_s3 = smov 128   ;;  %s450_s1 = int_to_ptr.vmem [resolvable:$true] %s449_s1 }
  0x2c   : > { %3325 = dma.hbm_to_vmem [thread:$0]  (!%p3979_p6), %s448_s30, 2048, %s450_s1, [#allocation15], %s5000_s3, %s5000_s3, %s4999_s20  }
  0x2d   : > { %s2742_s12 = sadd.s32 4294967294, %s3851_s28   ;;  %s4032_s13 = sadd.s32 1, %s3851_s28  }
  0x2e   : > { %s40_s29 = sadd.s32 1, %s3847_s27  ;;  %s37_s18 = ssub.s32 %s3851_s28, %s4032_s13 }
  0x2f   : > { %p47_p7 = scmp.ne.s32.totalorder %s3847_s27, %s3843_s26  ;;  %p38_p8 = scmp.eq.s32.totalorder %s37_s18, 0 }
  0x30   : > { %p48_p9 = scmp.eq.s32.totalorder %s3851_s28, 0  ;;  %p53_p10 = scmp.ne.s32.totalorder %s3843_s26, %s3839_s25 }
  0x31   : > { %p329_p11 = scmp.eq.s32.totalorder %s3962_s15, 1  ;;  %p335_p2 = scmp.eq.s32.totalorder %s2742_s12, 1 }
  0x32   : > { %s4044_s17 = scalar_select %p38_p8, %s3847_s27, %s40_s29  }
  0x33   : > { %p4046_p12 = por %p48_p9, %p47_p7  ;;  %p4052_p13 = por %p54_p1, %p53_p10 }
  0x34   : > { %p4056_p0 = por %p329_p11, %p47_p7  ;;  %p3341_p4 = scmp.lt.s32.totalorder %s3851_s28, 2 }
  0x35   : > { %s466_s23 = sand.u32 1, %s3847_s27   ;;  %p4062_p6 = por %p335_p2, %p53_p10 }
  0x36   : > { %s2752_s30 = sshll.u32 %s466_s23, 8  ;;  %s3157_s24 = sshll.u32 %s3851_s28, 8 }
  0x37   : > { %s476_s3 = scalar_lea.hbm %s4966_s0, %s3157_s24  ;;  %s470_s18 = scalar_lea.vmem [#allocation2], %s2752_s30 }
  0x38   : > { %s477_s29 = sshll.u32 %s476_s3, 4  ;;  %s479_s2 = sshll.u32 %s470_s18, 4  ;;  %s478_s29 = int_to_ptr.hbm [resolvable:$true] %s477_s29  ;;  %s480_s2 = int_to_ptr.vmem [resolvable:$true] %s479_s2 }
  0x39   : > { %p4072_p7 = pnand %p3341_p4, %p4046_p12  ;;  %s467_s5 = scalar_lea.sflag [#allocation3], %s466_s23 }
  0x3a   : > { %s3739_s7 = sshra.s32 %s478_s29, 4  ;;  %s3746_s1 = scalar_lea.hbm %s4966_s0, 512  ;;  %s3740_s7 = int_to_ptr.hbm [resolvable:$true] %s3739_s7 }
  0x3b   : > { %s3741_s9 = scalar_lea.hbm %s3740_s7, 256  ;;  %p3743_p9 = pneg %p4072_p7 }
  0x3c   : > { %p3742_p8 = scmp.ne.s32.totalorder %s3740_s7, %s3741_s9  ;;  %p3747_p12 = scmp.lt.s32.totalorder %s3740_s7, %s4966_s0 }
  0x3d   : > { %p3748_p2 = scmp.lt.s32.totalorder %s3746_s1, %s3741_s9 }
  0x3e   : > { %p3744_p10 = pnand %p3743_p9, %p3742_p8 }
  0x3f   : > { %p3749_p4 = por %p3748_p2, %p3747_p12 }
  0x40   : > { %p3745_p11 = pneg %p3744_p10 }
  0x42   : > { %p3750_p5 = pnand %p3749_p4, %p3745_p11 }
  0x44   : > { %3753 = shalt.err (!%p3750_p5)
}
  0x45   : > { %s3864_s23 = smov 256   ;;  %s3865_s3 = smov 16  }
  0x46   : > { %3329 = dma.hbm_to_vmem [thread:$0]  (!%p4072_p7), %s478_s29, 4096, %s480_s2, %s467_s5, %s3864_s23, %s3864_s23, %s3865_s3  }
  0x47   : > { %491 = sbr.rel (%p3967_p3) target bundleno = 1228 (0x4cc), region = 72  ;;  %s4089_s18 = sand.u32 (!%p3967_p3), 1, %s3843_s26  }
  0x48   : > { %s2757_s24 = sshll.u32 (!%p3967_p3), %s4089_s18, 8  ;;  %s494_s7 = scalar_lea.sflag (!%p3967_p3), [#allocation3], %s4089_s18 }
  0x49   : > { %s4093_s9 = scalar_lea.vmem (!%p3967_p3), [#allocation2], %s2757_s24 }
  0x4c   : > { %3814 = dma.done.wait (%p4052_p13), %s494_s7, 4096  }
  0x4d   : > { %3816 = vsyncadd (%p4052_p13), %s494_s7, 4294963200 }
  0x4e   : > { %3818 = dma.done.wait (%p54_p1), [#allocation6], 4128  }
  0x4f   : > { %3820 = vsyncadd (%p54_p1), [#allocation6], 4294963168 }
  0x50   : > { %3822 = dma.done.wait (%p54_p1), [#allocation9], 3072  }
  0x51   : > { %3824 = vsyncadd (%p54_p1), [#allocation9], 4294964224 }
  0x52   : > { %3826 = dma.done.wait (%p54_p1), [#allocation12], 2048  }
  0x53   : > { %3828 = vsyncadd (%p54_p1), [#allocation12], 4294965248 }
  0x54   : > { %3830 = dma.done.wait (%p54_p1), [#allocation15], 2048  }
  0x55   : > { %3832 = vsyncadd (%p54_p1), [#allocation15], 4294965248  ;;  %v2824_v0 = vld [vmem:[#allocation5 + $0x70] sm:$0xf]  ;;  %v3173_v1 = vld [vmem:[#allocation5 + $0x74] sm:$0xf0] }
  0x56   : > { %v2816_v2 = vld [vmem:[#allocation5 + $0x60] sm:$0xf]  ;;  %v2825_v3 = vor.u32 %v3173_v1, %v2824_v0  ;;  %v3171_v4 = vld [vmem:[#allocation5 + $0x64] sm:$0xf0]  ;;  %v2888_v5 = vld [vmem:[#allocation5 + $0xf0] sm:$0xf] }
  0x57   : > { %v3189_v6 = vld [vmem:[#allocation5 + $0xf4] sm:$0xf0]  ;;  %v2817_v7 = vor.u32 %v3171_v4, %v2816_v2  ;;  %v2880_v9 = vld [vmem:[#allocation5 + $0xe0] sm:$0xf]  ;;  %v3187_v10 = vld [vmem:[#allocation5 + $0xe4] sm:$0xf0] }
  0x58   : > { %824 = vmatpush.bf16.msra.mxu0 %v2825_v3  ;;  %3248 = vmatpush.bf16.msra.mxu3 %v2825_v3  ;;  %v4115_v8 = vor.u32 %v3189_v6, %v2888_v5  ;;  %v2808_v11 = vld [vmem:[#allocation5 + $0x50] sm:$0xf]  ;;  %v3169_v12 = vld [vmem:[#allocation5 + $0x54] sm:$0xf0]  ;;  %v4118_v13 = vor.u32 %v3187_v10, %v2880_v9  ;;  %v2800_v17 = vld [vmem:[#allocation5 + $0x40] sm:$0xf] }
  0x59   : > { %v2872_v14 = vld [vmem:[#allocation5 + $0xd0] sm:$0xf]  ;;  %v3185_v15 = vld [vmem:[#allocation5 + $0xd4] sm:$0xf0]  ;;  %v2809_v16 = vor.u32 %v3169_v12, %v2808_v11  ;;  %v3167_v18 = vld [vmem:[#allocation5 + $0x44] sm:$0xf0] }
  0x5a   : > { %3256 = vmatpush.bf16.msra.mxu1 %v4115_v8  ;;  %v4121_v19 = vor.u32 %v3185_v15, %v2872_v14  ;;  %v2864_v20 = vld [vmem:[#allocation5 + $0xc0] sm:$0xf]  ;;  %v3183_v21 = vld [vmem:[#allocation5 + $0xc4] sm:$0xf0]  ;;  %v2801_v22 = vor.u32 %v3167_v18, %v2800_v17  ;;  %v2792_v23 = vld [vmem:[#allocation5 + $0x30] sm:$0xf] }
  0x5b   : > { %v3165_v24 = vld [vmem:[#allocation5 + $0x34] sm:$0xf0]  ;;  %v4124_v25 = vor.u32 %v3183_v21, %v2864_v20  ;;  %v2856_v26 = vld [vmem:[#allocation5 + $0xb0] sm:$0xf]  ;;  %v2784_v29 = vld [vmem:[#allocation5 + $0x20] sm:$0xf] }
  0x5c   : > { %825 = vmatpush.bf16.msra.mxu0 %v2817_v7  ;;  %3249 = vmatpush.bf16.msra.mxu3 %v2817_v7  ;;  %v3181_v27 = vld [vmem:[#allocation5 + $0xb4] sm:$0xf0]  ;;  %v2793_v28 = vor.u32 %v3165_v24, %v2792_v23  ;;  %v3163_v30 = vld [vmem:[#allocation5 + $0x24] sm:$0xf0]  ;;  %v2848_v32 = vld [vmem:[#allocation5 + $0xa0] sm:$0xf] }
  0x5d   : > { %v4127_v31 = vor.u32 %v3181_v27, %v2856_v26  ;;  %v3179_v33 = vld [vmem:[#allocation5 + $0xa4] sm:$0xf0]  ;;  %v2785_v34 = vor.u32 %v3163_v30, %v2784_v29  ;;  %v2776_v35 = vld [vmem:[#allocation5 + $0x10] sm:$0xf]  ;;  %v3161_v36 = vld [vmem:[#allocation5 + $0x14] sm:$0xf0] }
  0x5e   : > { %3257 = vmatpush.bf16.msra.mxu1 %v4118_v13  ;;  %v4130_v37 = vor.u32 %v3179_v33, %v2848_v32  ;;  %v2840_v38 = vld [vmem:[#allocation5 + $0x90] sm:$0xf]  ;;  %v3177_v39 = vld [vmem:[#allocation5 + $0x94] sm:$0xf0]  ;;  %v2777_v40 = vor.u32 %v3161_v36, %v2776_v35  ;;  %v2768_v41 = vld [vmem:[#allocation5] sm:$0xf] }
  0x5f   : > { %v3159_v42 = vld [vmem:[#allocation5 + $0x4] sm:$0xf0]  ;;  %v3188_v43 = vld [vmem:[#allocation5 + $0xf4] sm:$0xf]  ;;  %v2890_v44 = vld [vmem:[#allocation5 + $0xf8] sm:$0xf0]  ;;  %v4133_v45 = vor.u32 %v3177_v39, %v2840_v38 }
  0x60   : > { %826 = vmatpush.bf16.msra.mxu0 %v2809_v16  ;;  %3250 = vmatpush.bf16.msra.mxu3 %v2809_v16  ;;  %v578_v46 = vld [vmem:[%s4093_s9] sm:$0xff]  ;;  %v3175_v48 = vld [vmem:[#allocation5 + $0x84] sm:$0xf0]  ;;  %v2769_v49 = vor.u32 %v3159_v42, %v2768_v41  ;;  %v580_v50 = vld [vmem:[%s4093_s9 + $0x10] sm:$0xff]  ;;  %v2893_v53 = vor.u32 %v3188_v43, %v2890_v44  ;;  %s5006_s23 = sld [smem:[#allocation29_spill]]  ;;  %s2765_s3 = sshll.u32 %s4089_s18, 7 }
  0x61   : > { %v2832_v47 = vld [vmem:[#allocation5 + $0x80] sm:$0xf]  ;;  %v588_v52 = vld [vmem:[%s4093_s9 + $0x50] sm:$0xff]  ;;  %v587_v55 = vld [vmem:[%s4093_s9 + $0x48] sm:$0xff]  ;;  %v4142_v57 = vpack.c.bf16 %v580_v50, %v578_v46  ;;  %s4417_s24 = scalar_lea.vmem [#allocation16], %s2765_s3  ;;  %s3247_s7 = sshll.u32 %s3962_s15, 7 }
  0x62   : > { %3258 = vmatpush.bf16.msra.mxu1 %v4121_v19  ;;  %v586_v51 = vld [vmem:[%s4093_s9 + $0x40] sm:$0xff]  ;;  %v2833_v54 = vor.u32 %v3175_v48, %v2832_v47  ;;  %v589_v56 = vld [vmem:[%s4093_s9 + $0x58] sm:$0xff]  ;;  %v2882_v60 = vld [vmem:[#allocation5 + $0xe8] sm:$0xf0]  ;;  %s5073_s5 = sld [smem:[#allocation30_spill]]  ;;  %s2599_s15 = sshll.u32 %s4417_s24, 4  ;;  %s2600_s15 = int_to_ptr.vmem [resolvable:$true] %s2599_s15 }
  0x63   : > { %v4144_v58 = vpack.c.bf16 %v588_v52, %v586_v51  ;;  %v3186_v59 = vld [vmem:[#allocation5 + $0xe4] sm:$0xf]  ;;  %v4147_v61 = vpack.c.bf16 %v589_v56, %v587_v55  ;;  %v3184_v63 = vld [vmem:[#allocation5 + $0xd4] sm:$0xf]  ;;  %v2874_v0 = vld [vmem:[#allocation5 + $0xd8] sm:$0xf0] }
  0x64   : > { %827 = vmatpush.bf16.msra.mxu0 %v2801_v22  ;;  %3251 = vmatpush.bf16.msra.mxu3 %v2801_v22  ;;  %v2885_v62 = vor.u32 %v3186_v59, %v2882_v60  ;;  %v2877_v1 = vor.u32 %v3184_v63, %v2874_v0  ;;  %v3182_v2 = vld [vmem:[#allocation5 + $0xc4] sm:$0xf]  ;;  %v2866_v3 = vld [vmem:[#allocation5 + $0xc8] sm:$0xf0]  ;;  %v584_v6 = vld [vmem:[%s4093_s9 + $0x30] sm:$0xff]  ;;  %s2586_s29 = scalar_lea.sflag [#allocation4], %s4089_s18 }
  0x65   : > { %v2869_v4 = vor.u32 %v3182_v2, %v2866_v3  ;;  %v582_v5 = vld [vmem:[%s4093_s9 + $0x20] sm:$0xff]  ;;  %v591_v9 = vld [vmem:[%s4093_s9 + $0x68] sm:$0xff]  ;;  %v593_v10 = vld [vmem:[%s4093_s9 + $0x78] sm:$0xff] }
  0x66   : > { %3259 = vmatpush.bf16.msra.mxu1 %v4124_v25  ;;  %v590_v7 = vld [vmem:[%s4093_s9 + $0x60] sm:$0xff]  ;;  %v4161_v11 = vpack.c.bf16 %v584_v6, %v582_v5  ;;  %v3180_v14 = vld [vmem:[#allocation5 + $0xb4] sm:$0xf]  ;;  %v2858_v15 = vld [vmem:[#allocation5 + $0xb8] sm:$0xf0] }
  0x67   : > { %v2861_v16 = vor.u32 %v3180_v14, %v2858_v15  ;;  %v3178_v17 = vld [vmem:[#allocation5 + $0xa4] sm:$0xf]  ;;  %v2850_v18 = vld [vmem:[#allocation5 + $0xa8] sm:$0xf0]  ;;  %v2826_v21 = vld [vmem:[#allocation5 + $0x78] sm:$0xf0] }
  0x68   : > { %828 = vmatpush.bf16.msra.mxu0 %v2793_v28  ;;  %3252 = vmatpush.bf16.msra.mxu3 %v2793_v28  ;;  %v2853_v20 = vor.u32 %v3178_v17, %v2850_v18  ;;  %v594_v23 = vld [vmem:[%s4093_s9 + $0x80] sm:$0xff]  ;;  %v596_v24 = vld [vmem:[%s4093_s9 + $0x90] sm:$0xff]  ;;  %v581_v26 = vld [vmem:[%s4093_s9 + $0x18] sm:$0xff]  ;;  %s2598_s16 = scalar_lea.hbm %s5073_s5, %s3247_s7  ;;  %s3789_s22 = scalar_lea.hbm %s5073_s5, 256 }
  0x69   : > { %v595_v27 = vld [vmem:[%s4093_s9 + $0x88] sm:$0xff]  ;;  %v597_v28 = vld [vmem:[%s4093_s9 + $0x98] sm:$0xff]  ;;  %v4179_v29 = vpack.c.bf16 %v596_v24, %v594_v23  ;;  %v3170_v32 = vld [vmem:[#allocation5 + $0x64] sm:$0xf]  ;;  %s2601_s19 = sshll.u32 %s2598_s16, 4  ;;  %s2602_s19 = int_to_ptr.hbm [resolvable:$true] %s2601_s19 }
  0x6a   : > { %3260 = vmatpush.bf16.msra.mxu1 %v4127_v31  ;;  %v2818_v33 = vld [vmem:[#allocation5 + $0x68] sm:$0xf0]  ;;  %v3168_v35 = vld [vmem:[#allocation5 + $0x54] sm:$0xf]  ;;  %v2810_v36 = vld [vmem:[#allocation5 + $0x58] sm:$0xf0] }
  0x6b   : > { %v3176_v38 = vld [vmem:[#allocation5 + $0x94] sm:$0xf]  ;;  %v2842_v39 = vld [vmem:[#allocation5 + $0x98] sm:$0xf0]  ;;  %v2802_v42 = vld [vmem:[#allocation5 + $0x48] sm:$0xf0] }
  0x6c   : > { %829 = vmatpush.bf16.msra.mxu0 %v2785_v34  ;;  %3253 = vmatpush.bf16.msra.mxu3 %v2785_v34  ;;  %v2821_v34 = vor.u32 %v3170_v32, %v2818_v33  ;;  %v2845_v41 = vor.u32 %v3176_v38, %v2842_v39  ;;  %v3164_v44 = vld [vmem:[#allocation5 + $0x34] sm:$0xf]  ;;  %v598_v46 = vld [vmem:[%s4093_s9 + $0xa0] sm:$0xff]  ;;  %v583_v48 = vld [vmem:[%s4093_s9 + $0x28] sm:$0xff]  ;;  %s3783_s12 = sshra.s32 %s2602_s19, 4  ;;  %s3784_s12 = int_to_ptr.hbm [resolvable:$true] %s3783_s12 }
  0x6d   : > { %v600_v47 = vld [vmem:[%s4093_s9 + $0xb0] sm:$0xff]  ;;  %v599_v51 = vld [vmem:[%s4093_s9 + $0xa8] sm:$0xff]  ;;  %v601_v52 = vld [vmem:[%s4093_s9 + $0xb8] sm:$0xff]  ;;  %s3785_s30 = scalar_lea.hbm %s3784_s12, 128  ;;  %p3790_p13 = scmp.lt.s32.totalorder %s3784_s12, %s5073_s5 }
  0x6e   : > { %3261 = vmatpush.bf16.msra.mxu1 %v4130_v37  ;;  %v4194_v55 = vpack.c.bf16 %v601_v52, %v599_v51  ;;  %v3162_v56 = vld [vmem:[#allocation5 + $0x24] sm:$0xf]  ;;  %v2786_v59 = vld [vmem:[#allocation5 + $0x28] sm:$0xf0]  ;;  %v3160_v0 = vld [vmem:[#allocation5 + $0x14] sm:$0xf]  ;;  %p3786_p1 = scmp.ne.s32.totalorder %s3784_s12, %s3785_s30  ;;  %p3791_p7 = scmp.lt.s32.totalorder %s3789_s22, %s3785_s30 }
  0x6f   : > { %v2789_v60 = vor.u32 %v3162_v56, %v2786_v59  ;;  %v2834_v63 = vld [vmem:[#allocation5 + $0x88] sm:$0xf0]  ;;  %v2778_v2 = vld [vmem:[#allocation5 + $0x18] sm:$0xf0]  ;;  %v608_v17 = vld [vmem:[%s4093_s9 + $0xf0] sm:$0xff] }
  0x70   : > { %830 = vmatpush.bf16.msra.mxu0 %v2777_v40  ;;  %3254 = vmatpush.bf16.msra.mxu3 %v2777_v40  ;;  %v3166_v40 = vld [vmem:[#allocation5 + $0x44] sm:$0xf]  ;;  %v2781_v3 = vor.u32 %v3160_v0, %v2778_v2  ;;  %v2770_v5 = vld [vmem:[#allocation5 + $0x8] sm:$0xf0]  ;;  %v3193_v24 = vld [vmem:[#allocation8 + $0x18] sm:$0xff]  ;;  %p3787_p3 = pnand %p3786_p1, %p4056_p0  ;;  %p3792_p8 = por %p3791_p7, %p3790_p13 }
  0x71   : > { %v2805_v43 = vor.u32 %v3166_v40, %v2802_v42  ;;  %v607_v18 = vld [vmem:[%s4093_s9 + $0xe8] sm:$0xff]  ;;  %v3201_v42 = vld [vmem:[#allocation8 + $0x58] sm:$0xff] }
  0x72   : > { %3262 = vmatpush.bf16.msra.mxu1 %v4133_v45  ;;  %v3194_v23 = vld [vmem:[#allocation8 + $0x20] sm:$0xff]  ;;  %v3203_v32 = vld [vmem:[#allocation8 + $0x68] sm:$0xff]  ;;  %p3788_p5 = pneg %p3787_p3 }
  0x74   : > { %831 = vmatpush.bf16.msra.mxu0 %v2769_v49  ;;  %3255 = vmatpush.bf16.msra.mxu3 %v2769_v49  ;;  %v585_v49 = vld [vmem:[%s4093_s9 + $0x38] sm:$0xff]  ;;  %p3793_p9 = pnand %p3792_p8, %p3788_p5 }
  0x76   : > { %3263 = vmatpush.bf16.msra.mxu1 %v2833_v54 }
  0x77   : > { %832 = vmatmul.bf16.vlgmr.msra.gmra.mxu0 %v4142_v57  ;;  %842 = vmatmul.bf16.vlgmr.msra.gmra.mxu3 %v4144_v58 }
  0x78   : > { %971 = vmatpush.bf16.msrb.mxu3 %v2893_v53  ;;  %873 = vmatpush.bf16.msrb.mxu0 %v4115_v8  ;;  %v592_v8 = vld [vmem:[%s4093_s9 + $0x70] sm:$0xff]  ;;  %v620_v53 = vpack.c.bf16 %v600_v47, %v598_v46 }
  0x79   : > { %891 = vmatmul.bf16.vlgmr.msra.gmra.mxu1 %v4147_v61  ;;  %v4163_v12 = vpack.c.bf16 %v592_v8, %v590_v7  ;;  %v602_v7 = vld [vmem:[%s4093_s9 + $0xc0] sm:$0xff]  ;;  %v604_v8 = vld [vmem:[%s4093_s9 + $0xd0] sm:$0xff] }
  0x7a   : > { %v622_v14 = vpack.c.bf16 %v604_v8, %v602_v7 }
  0x7c   : > { %874 = vmatpush.bf16.msrb.mxu0 %v4118_v13  ;;  %972 = vmatpush.bf16.msrb.mxu3 %v2885_v62  ;;  %v4166_v13 = vpack.c.bf16 %v593_v10, %v591_v9  ;;  %v3174_v62 = vld [vmem:[#allocation5 + $0x84] sm:$0xf]  ;;  %v603_v9 = vld [vmem:[%s4093_s9 + $0xc8] sm:$0xff]  ;;  %v605_v10 = vld [vmem:[%s4093_s9 + $0xd8] sm:$0xff] }
  0x7d   : > { %v4202_v15 = vpack.c.bf16 %v605_v10, %v603_v9 }
  0x80   : > { %875 = vmatpush.bf16.msrb.mxu0 %v4121_v19  ;;  %973 = vmatpush.bf16.msrb.mxu3 %v2877_v1  ;;  %v3172_v19 = vld [vmem:[#allocation5 + $0x74] sm:$0xf]  ;;  %v2837_v1 = vor.u32 %v3174_v62, %v2834_v63 }
  0x81   : > { %v2829_v22 = vor.u32 %v3172_v19, %v2826_v21  ;;  %v609_v19 = vld [vmem:[%s4093_s9 + $0xf8] sm:$0xff] }
  0x82   : > { %v4211_v21 = vpack.c.bf16 %v609_v19, %v607_v18 }
  0x83   : > { %3264 = vmatpush.bf16.msra.mxu2 %v2829_v22 }
  0x84   : > { %876 = vmatpush.bf16.msrb.mxu0 %v4124_v25  ;;  %974 = vmatpush.bf16.msrb.mxu3 %v2869_v4  ;;  %v579_v25 = vld [vmem:[%s4093_s9 + $0x8] sm:$0xff]  ;;  %v3158_v4 = vld [vmem:[#allocation5 + $0x4] sm:$0xf] }
  0x85   : > { %v4181_v30 = vpack.c.bf16 %v581_v26, %v579_v25  ;;  %v2773_v6 = vor.u32 %v3158_v4, %v2770_v5  ;;  %v3192_v25 = vld [vmem:[#allocation8 + $0x10] sm:$0xff] }
  0x86   : > { %v3204_v26 = vld [vmem:[#allocation8 + $0x70] sm:$0xff] }
  0x87   : > { %837 = vmatmul.bf16.gmra.mxu0 %v4161_v11  ;;  %847 = vmatmul.bf16.gmra.mxu3 %v4163_v12 }
  0x88   : > { %877 = vmatpush.bf16.msrb.mxu0 %v4127_v31  ;;  %975 = vmatpush.bf16.msrb.mxu3 %v2861_v16  ;;  %v4183_v31 = vpack.c.bf16 %v597_v28, %v595_v27  ;;  %v606_v16 = vld [vmem:[%s4093_s9 + $0xe0] sm:$0xff]  ;;  %v3191_v28 = vld [vmem:[#allocation8 + $0x8] sm:$0xff] }
  0x89   : > { %896 = vmatmul.bf16.gmra.mxu1 %v4166_v13  ;;  %3265 = vmatpush.bf16.msra.mxu2 %v2821_v34 }
  0x8c   : > { %878 = vmatpush.bf16.msrb.mxu0 %v4130_v37  ;;  %976 = vmatpush.bf16.msrb.mxu3 %v2853_v20  ;;  %v2813_v37 = vor.u32 %v3168_v35, %v2810_v36  ;;  %v624_v20 = vpack.c.bf16 %v608_v17, %v606_v16  ;;  %v3198_v16 = vld [vmem:[#allocation8 + $0x40] sm:$0xff] }
  0x8e   : > { %3266 = vmatpush.bf16.msra.mxu2 %v2813_v37 }
  0x90   : > { %879 = vmatpush.bf16.msrb.mxu0 %v4133_v45  ;;  %977 = vmatpush.bf16.msrb.mxu3 %v2845_v41  ;;  %v2794_v45 = vld [vmem:[#allocation5 + $0x38] sm:$0xf0] }
  0x91   : > { %v2797_v50 = vor.u32 %v3164_v44, %v2794_v45 }
  0x92   : > { %3267 = vmatpush.bf16.msra.mxu2 %v2805_v43 }
  0x94   : > { %880 = vmatpush.bf16.msrb.mxu0 %v2833_v54  ;;  %v613_v54 = vpack.c.bf16 %v585_v49, %v583_v48  ;;  %978 = vmatpush.bf16.msrb.mxu3 %v2837_v1 }
  0x96   : > { %3268 = vmatpush.bf16.msra.mxu2 %v2797_v50 }
  0x97   : > { %852 = vmatmul.bf16.gmra.mxu3 %v4179_v29  ;;  %881 = vmatmul.bf16.vlgmr.msrb.gmra.mxu0 %v4181_v30 }
  0x98   : > { %922 = vmatpush.bf16.msra.mxu0 %v2829_v22  ;;  %v3205_v22 = vld [vmem:[#allocation8 + $0x78] sm:$0xff] }
  0x99   : > { %901 = vmatmul.bf16.gmra.mxu1 %v4183_v31 }
  0x9a   : > { %3269 = vmatpush.bf16.msra.mxu2 %v2789_v60  ;;  %1249 = vmatpush.bf16.msrb.mxu1 %v3205_v22 }
  0x9c   : > { %923 = vmatpush.bf16.msra.mxu0 %v2821_v34 }
  0x9e   : > { %3270 = vmatpush.bf16.msra.mxu2 %v2781_v3  ;;  %1250 = vmatpush.bf16.msrb.mxu1 %v3204_v26 }
  0xa0   : > { %924 = vmatpush.bf16.msra.mxu0 %v2813_v37  ;;  %v3202_v37 = vld [vmem:[#allocation8 + $0x60] sm:$0xff] }
  0xa2   : > { %3271 = vmatpush.bf16.msra.mxu2 %v2773_v6  ;;  %1251 = vmatpush.bf16.msrb.mxu1 %v3203_v32 }
  0xa4   : > { %925 = vmatpush.bf16.msra.mxu0 %v2805_v43 }
  0xa5   : > { %940 = vmatmul.bf16.vlgmr.msra.gmra.mxu2 %v4144_v58  ;;  %v3196_v58 = vld [vmem:[#allocation8 + $0x30] sm:$0xff] }
  0xa6   : > { %1252 = vmatpush.bf16.msrb.mxu1 %v3202_v37 }
  0xa7   : > { %857 = vmatmul.bf16.gmra.mxu3 %v620_v53  ;;  %886 = vmatmul.bf16.gmra.mxu0 %v613_v54 }
  0xa8   : > { %926 = vmatpush.bf16.msra.mxu0 %v2797_v50 }
  0xa9   : > { %906 = vmatmul.bf16.gmra.mxu1 %v4194_v55 }
  0xaa   : > { %1253 = vmatpush.bf16.msrb.mxu1 %v3201_v42 }
  0xac   : > { %927 = vmatpush.bf16.msra.mxu0 %v2789_v60 }
  0xb0   : > { %928 = vmatpush.bf16.msra.mxu0 %v2781_v3  ;;  %v3199_v3 = vld [vmem:[#allocation8 + $0x48] sm:$0xff] }
  0xb4   : > { %929 = vmatpush.bf16.msra.mxu0 %v2773_v6 }
  0xb5   : > { %945 = vmatmul.bf16.gmra.mxu2 %v4163_v12  ;;  %v3195_v12 = vld [vmem:[#allocation8 + $0x28] sm:$0xff] }
  0xb7   : > { %862 = vmatmul.bf16.gmra.mxu3 %v622_v14  ;;  %930 = vmatmul.bf16.vlgmr.msra.gmra.mxu0 %v4142_v57  ;;  %v3197_v57 = vld [vmem:[#allocation8 + $0x38] sm:$0xff] }
  0xb8   : > { %1200 = vmatpush.bf16.msrb.mxu0 %v3197_v57 }
  0xb9   : > { %911 = vmatmul.bf16.gmra.mxu1 %v4202_v15 }
  0xbc   : > { %1201 = vmatpush.bf16.msrb.mxu0 %v3196_v58 }
  0xc0   : > { %1202 = vmatpush.bf16.msrb.mxu0 %v3195_v12 }
  0xc4   : > { %1203 = vmatpush.bf16.msrb.mxu0 %v3194_v23 }
  0xc5   : > { %950 = vmatmul.bf16.gmra.mxu2 %v4179_v29 }
  0xc7   : > { %867 = vmatmul.bf16.gmra.mxu3 %v624_v20  ;;  %935 = vmatmul.bf16.gmra.mxu0 %v4161_v11 }
  0xc8   : > { %1204 = vmatpush.bf16.msrb.mxu0 %v3193_v24 }
  0xc9   : > { %916 = vmatmul.bf16.gmra.mxu1 %v4211_v21 }
  0xcc   : > { %1205 = vmatpush.bf16.msrb.mxu0 %v3192_v25 }
  0xd0   : > { %1206 = vmatpush.bf16.msrb.mxu0 %v3191_v28 }
  0xd5   : > { %955 = vmatmul.bf16.gmra.mxu2 %v620_v53 }
  0xd7   : > { %979 = vmatmul.bf16.vlgmr.msrb.gmra.mxu3 %v4181_v30  ;;  %v3190_v30 = vld [vmem:[#allocation8] sm:$0xff] }
  0xd8   : > { %1207 = vmatpush.bf16.msrb.mxu0 %v3190_v30 }
  0xe5   : > { %960 = vmatmul.bf16.gmra.mxu2 %v622_v14 }
  0xe7   : > { %984 = vmatmul.bf16.gmra.mxu3 %v613_v54 }
  0xf4   : > { %v833_v11 = vpop.f32.mrf.mxu0 }
  0xf5   : > { %965 = vmatmul.bf16.gmra.mxu2 %v624_v20 }
  0xf6   : > { %v892_v43 = vpop.f32.mrf.mxu1 }
  0xf7   : > { %989 = vmatmul.bf16.gmra.mxu3 %v4147_v61  ;;  %v4219_v61 = vld [vmem:[#allocation7] sm:$0x3] }
  0xf8   : > { %v4222_v40 = vperm.slane %v4219_v61, 0 }
  0xfa   : > { %v843_v27 = vpop.f32.mrf.mxu3  ;;  %v834_v41 = vadd.f32 %v833_v11, %v4222_v40 }
  0xfb   : > { %v844_v7 = vadd.f32 %v843_v27, %v4222_v40 }
  0xfc   : > { %v835_v29 = vpop.f32.mrf.mxu0 }
  0xfd   : > { %v893_v10 = vadd.f32 %v892_v43, %v844_v7 }
  0xfe   : > { %v894_v51 = vpop.f32.mrf.mxu1 }
  0xff   : > { %v1028_v17 = vmax.f32 %v893_v10, 0.0 }
 0x102   : > { %v845_v33 = vpop.f32.mrf.mxu3 }
 0x103   : > { %v846_v6 = vadd.f32 %v845_v33, %v4222_v40 }
 0x104   : > { %v838_v34 = vpop.f32.mrf.mxu0 }
 0x105   : > { %v839_v54 = vadd.f32 %v838_v34, %v4222_v40  ;;  %v895_v8 = vadd.f32 %v894_v51, %v846_v6 }
 0x106   : > { %v897_v62 = vpop.f32.mrf.mxu1 }
 0x107   : > { %994 = vmatmul.bf16.gmra.mxu3 %v4166_v13  ;;  %v836_v13 = vadd.f32 %v835_v29, %v4222_v40  ;;  %v1030_v14 = vmax.f32 %v895_v8, 0.0  ;;  %v3213_v8 = vld [vmem:[#allocation10 + $0x38] sm:$0xff] }
 0x108   : > { %1390 = vmatpush.bf16.msrb.mxu2 %v3213_v8 }
 0x109   : > { %v1056_v19 = vpack.c.bf16 %v1030_v14, %v1028_v17 }
 0x10a   : > { %v848_v35 = vpop.f32.mrf.mxu3 }
 0x10b   : > { %v849_v58 = vadd.f32 %v848_v35, %v4222_v40 }
 0x10c   : > { %v840_v36 = vpop.f32.mrf.mxu0 }
 0x10d   : > { %v841_v59 = vadd.f32 %v840_v36, %v4222_v40  ;;  %v898_v23 = vadd.f32 %v897_v62, %v849_v58 }
 0x10f   : > { %v1032_v11 = vmax.f32 %v898_v23, 0.0 }
 0x112   : > { %v850_v38 = vpop.f32.mrf.mxu3 }
 0x113   : > { %v851_v57 = vadd.f32 %v850_v38, %v4222_v40 }
 0x114   : > { %v882_v39 = vpop.f32.mrf.mxu0 }
 0x115   : > { %v883_v45 = vadd.f32 %v882_v39, %v834_v41 }
 0x117   : > { %999 = vmatmul.bf16.gmra.mxu3 %v4183_v31  ;;  %v1020_v48 = vmax.f32 %v883_v45, 0.0  ;;  %v3200_v31 = vld [vmem:[#allocation8 + $0x50] sm:$0xff] }
 0x118   : > { %1254 = vmatpush.bf16.msrb.mxu1 %v3200_v31 }
 0x11a   : > { %v853_v44 = vpop.f32.mrf.mxu3 }
 0x11b   : > { %v854_v30 = vadd.f32 %v853_v44, %v4222_v40 }
 0x11c   : > { %v884_v46 = vpop.f32.mrf.mxu0  ;;  %1255 = vmatpush.bf16.msrb.mxu1 %v3199_v3 }
 0x11d   : > { %v885_v47 = vadd.f32 %v884_v46, %v836_v13 }
 0x11f   : > { %v1022_v49 = vmax.f32 %v885_v47, 0.0 }
 0x120   : > { %1256 = vmatpush.bf16.msrb.mxu1 %v3198_v16 }
 0x121   : > { %v1052_v50 = vpack.c.bf16 %v1022_v49, %v1020_v48 }
 0x122   : > { %v855_v52 = vpop.f32.mrf.mxu3 }
 0x123   : > { %1208 = vmatmul.bf16.vlgmr.msrb.gmra.mxu0 %v1052_v50  ;;  %v856_v29 = vadd.f32 %v855_v52, %v4222_v40 }
 0x124   : > { %v887_v53 = vpop.f32.mrf.mxu0 }
 0x125   : > { %v888_v60 = vadd.f32 %v887_v53, %v839_v54 }
 0x127   : > { %1004 = vmatmul.bf16.gmra.mxu3 %v4194_v55  ;;  %v1024_v1 = vmax.f32 %v888_v60, 0.0  ;;  %v899_v55 = vpop.f32.mrf.mxu1 }
 0x128   : > { %v900_v22 = vadd.f32 %v899_v55, %v851_v57  ;;  %v941_v41 = vpop.f32.mrf.mxu2 }
 0x12a   : > { %v4229_v56 = vpop.f32.mrf.mxu3  ;;  %v1034_v24 = vmax.f32 %v900_v22, 0.0 }
 0x12b   : > { %v859_v49 = vadd.f32 %v4229_v56, %v4222_v40 }
 0x12c   : > { %v889_v63 = vpop.f32.mrf.mxu0  ;;  %v1058_v26 = vpack.c.bf16 %v1034_v24, %v1032_v11  ;;  %v3212_v11 = vld [vmem:[#allocation10 + $0x30] sm:$0xff] }
 0x12d   : > { %v890_v0 = vadd.f32 %v889_v63, %v841_v59  ;;  %1391 = vmatpush.bf16.msrb.mxu2 %v3212_v11  ;;  %v3206_v11 = vld [vmem:[#allocation10] sm:$0xff] }
 0x12f   : > { %v1026_v2 = vmax.f32 %v890_v0, 0.0  ;;  %v902_v18 = vpop.f32.mrf.mxu1 }
 0x130   : > { %v903_v35 = vadd.f32 %v902_v18, %v854_v30  ;;  %v943_v54 = vpop.f32.mrf.mxu2 }
 0x131   : > { %v1054_v4 = vpack.c.bf16 %v1026_v2, %v1024_v1 }
 0x132   : > { %v860_v5 = vpop.f32.mrf.mxu3  ;;  %v1036_v39 = vmax.f32 %v903_v35, 0.0 }
 0x133   : > { %1213 = vmatmul.bf16.gmra.mxu0 %v1054_v4 }
 0x134   : > { %v931_v25 = vpop.f32.mrf.mxu0 }
 0x137   : > { %1009 = vmatmul.bf16.gmra.mxu3 %v4202_v15  ;;  %v904_v15 = vpop.f32.mrf.mxu1 }
 0x138   : > { %v905_v32 = vadd.f32 %v904_v15, %v856_v29  ;;  %v946_v56 = vpop.f32.mrf.mxu2 }
 0x13a   : > { %v4235_v9 = vpop.f32.mrf.mxu3  ;;  %v1038_v36 = vmax.f32 %v905_v32, 0.0 }
 0x13b   : > { %v864_v10 = vadd.f32 %v4235_v9, %v4222_v40 }
 0x13c   : > { %v933_v33 = vpop.f32.mrf.mxu0  ;;  %v1060_v13 = vpack.c.bf16 %v1038_v36, %v1036_v39 }
 0x13f   : > { %v907_v28 = vpop.f32.mrf.mxu1 }
 0x140   : > { %v908_v31 = vadd.f32 %v907_v28, %v859_v49  ;;  %v948_v22 = vpop.f32.mrf.mxu2 }
 0x142   : > { %v865_v20 = vpop.f32.mrf.mxu3  ;;  %v1040_v63 = vmax.f32 %v908_v31, 0.0 }
 0x143   : > { %1218 = vmatmul.bf16.gmra.mxu0 %v1056_v19  ;;  %v866_v6 = vadd.f32 %v865_v20, %v4222_v40 }
 0x144   : > { %v936_v44 = vpop.f32.mrf.mxu0 }
 0x147   : > { %1014 = vmatmul.bf16.gmra.mxu3 %v4211_v21  ;;  %v4247_v21 = vperm.slane %v4219_v61, 1  ;;  %v909_v38 = vpop.f32.mrf.mxu1  ;;  %v861_v61 = vadd.f32 %v860_v5, %v4222_v40 }
 0x149   : > { %v932_v37 = vadd.f32 %v931_v25, %v4247_v21  ;;  %v934_v42 = vadd.f32 %v933_v33, %v4247_v21  ;;  %v910_v52 = vadd.f32 %v909_v38, %v861_v61  ;;  %v937_v60 = vadd.f32 %v936_v44, %v4247_v21 }
 0x14a   : > { %v4240_v12 = vpop.f32.mrf.mxu3  ;;  %v942_v58 = vadd.f32 %v941_v41, %v4247_v21  ;;  %v944_v20 = vadd.f32 %v943_v54, %v4247_v21  ;;  %v947_v39 = vadd.f32 %v946_v56, %v4247_v21  ;;  %v3211_v41 = vld [vmem:[#allocation10 + $0x28] sm:$0xff] }
 0x14b   : > { %v1042_v59 = vmax.f32 %v910_v52, 0.0  ;;  %v869_v32 = vadd.f32 %v4240_v12, %v4222_v40  ;;  %1392 = vmatpush.bf16.msrb.mxu2 %v3211_v41  ;;  %v4278_v41 = vld [vmem:[%s4970_s4] ss:$0 sm:$0xff] }
 0x14c   : > { %v938_v62 = vpop.f32.mrf.mxu0 }
 0x14d   : > { %v939_v0 = vadd.f32 %v938_v62, %v4247_v21  ;;  %v1062_v2 = vpack.c.bf16 %v1042_v59, %v1040_v63  ;;  %v3209_v63 = vld [vmem:[#allocation10 + $0x18] sm:$0xff] }
 0x14f   : > { %v912_v51 = vpop.f32.mrf.mxu1 }
 0x150   : > { %v913_v18 = vadd.f32 %v912_v51, %v864_v10  ;;  %v3207_v10 = vld [vmem:[#allocation10 + $0x8] sm:$0xff] }
 0x152   : > { %v4242_v27 = vpop.f32.mrf.mxu3  ;;  %v1044_v15 = vmax.f32 %v913_v18, 0.0 }
 0x153   : > { %1223 = vmatmul.bf16.gmra.mxu0 %v1058_v26  ;;  %v871_v9 = vadd.f32 %v4242_v27, %v4222_v40  ;;  %v949_v27 = vadd.f32 %v948_v22, %v4247_v21 }
 0x157   : > { %v914_v3 = vpop.f32.mrf.mxu1 }
 0x158   : > { %v915_v16 = vadd.f32 %v914_v3, %v866_v6 }
 0x15a   : > { %v980_v34 = vpop.f32.mrf.mxu3  ;;  %v1046_v57 = vmax.f32 %v915_v16, 0.0 }
 0x15b   : > { %v981_v43 = vadd.f32 %v980_v34, %v932_v37  ;;  %v951_v34 = vpop.f32.mrf.mxu2 }
 0x15c   : > { %v1064_v24 = vpack.c.bf16 %v1046_v57, %v1044_v15 }
 0x15d   : > { %v1021_v47 = vmax.f32 %v981_v43, 0.0 }
 0x15f   : > { %v917_v19 = vpop.f32.mrf.mxu1 }
 0x160   : > { %v918_v37 = vadd.f32 %v917_v19, %v869_v32 }
 0x162   : > { %v982_v45 = vpop.f32.mrf.mxu3 }
 0x163   : > { %v983_v46 = vadd.f32 %v982_v45, %v934_v42  ;;  %1228 = vmatmul.bf16.gmra.mxu0 %v1060_v13  ;;  %v1048_v42 = vmax.f32 %v918_v37, 0.0 }
 0x165   : > { %v1023_v48 = vmax.f32 %v983_v46, 0.0  ;;  %v953_v46 = vpop.f32.mrf.mxu2 }
 0x166   : > { %v954_v51 = vadd.f32 %v953_v46, %v4247_v21 }
 0x167   : > { %v1053_v50 = vpack.c.bf16 %v1023_v48, %v1021_v47  ;;  %v919_v30 = vpop.f32.mrf.mxu1  ;;  %v3210_v47 = vld [vmem:[#allocation10 + $0x20] sm:$0xff] }
 0x168   : > { %v920_v35 = vadd.f32 %v919_v30, %v871_v9  ;;  %1393 = vmatpush.bf16.msrb.mxu2 %v3210_v47 }
 0x169   : > { %1257 = vmatmul.bf16.vlgmr.msrb.gmra.mxu1 %v1053_v50  ;;  %v952_v50 = vadd.f32 %v951_v34, %v4247_v21 }
 0x16a   : > { %v985_v53 = vpop.f32.mrf.mxu3  ;;  %v1050_v38 = vmax.f32 %v920_v35, 0.0 }
 0x16b   : > { %v986_v1 = vadd.f32 %v985_v53, %v937_v60 }
 0x16c   : > { %v1066_v13 = vpack.c.bf16 %v1050_v38, %v1048_v42  ;;  %1394 = vmatpush.bf16.msrb.mxu2 %v3209_v63  ;;  %v3221_v42 = vld [vmem:[#allocation11 + $0x38] sm:$0xff]  ;;  %v3219_v63 = vld [vmem:[#allocation11 + $0x28] sm:$0xff] }
 0x16d   : > { %v1025_v55 = vmax.f32 %v986_v1, 0.0  ;;  %v956_v49 = vpop.f32.mrf.mxu2  ;;  %1531 = vmatpush.bf16.msra.mxu3 %v3221_v42 }
 0x16e   : > { %v957_v1 = vadd.f32 %v956_v49, %v4247_v21 }
 0x172   : > { %v987_v4 = vpop.f32.mrf.mxu3 }
 0x173   : > { %v988_v5 = vadd.f32 %v987_v4, %v939_v0  ;;  %1233 = vmatmul.bf16.gmra.mxu0 %v1062_v2 }
 0x175   : > { %v1027_v7 = vmax.f32 %v988_v5, 0.0  ;;  %v958_v60 = vpop.f32.mrf.mxu2  ;;  %v3208_v5 = vld [vmem:[#allocation10 + $0x10] sm:$0xff] }
 0x176   : > { %v959_v3 = vadd.f32 %v958_v60, %v4247_v21  ;;  %1395 = vmatpush.bf16.msrb.mxu2 %v3208_v5 }
 0x177   : > { %v1055_v14 = vpack.c.bf16 %v1027_v7, %v1025_v55 }
 0x179   : > { %1262 = vmatmul.bf16.gmra.mxu1 %v1055_v14 }
 0x17a   : > { %v990_v17 = vpop.f32.mrf.mxu3  ;;  %1396 = vmatpush.bf16.msrb.mxu2 %v3207_v10  ;;  %v3218_v10 = vld [vmem:[#allocation11 + $0x20] sm:$0xff] }
 0x17b   : > { %v991_v23 = vadd.f32 %v990_v17, %v942_v58 }
 0x17d   : > { %v1029_v28 = vmax.f32 %v991_v23, 0.0  ;;  %v961_v2 = vpop.f32.mrf.mxu2 }
 0x17e   : > { %v962_v17 = vadd.f32 %v961_v2, %v4247_v21  ;;  %1397 = vmatpush.bf16.msrb.mxu2 %v3206_v11 }
 0x182   : > { %v992_v25 = vpop.f32.mrf.mxu3 }
 0x183   : > { %v993_v26 = vadd.f32 %v992_v25, %v944_v20  ;;  %1238 = vmatmul.bf16.gmra.mxu0 %v1064_v24 }
 0x185   : > { %v1031_v29 = vmax.f32 %v993_v26, 0.0  ;;  %v963_v14 = vpop.f32.mrf.mxu2 }
 0x186   : > { %v964_v18 = vadd.f32 %v963_v14, %v4247_v21 }
 0x187   : > { %v1057_v33 = vpack.c.bf16 %v1031_v29, %v1029_v28 }
 0x189   : > { %1267 = vmatmul.bf16.gmra.mxu1 %v1057_v33 }
 0x18a   : > { %v995_v36 = vpop.f32.mrf.mxu3 }
 0x18b   : > { %v996_v43 = vadd.f32 %v995_v36, %v947_v39 }
 0x18d   : > { %v1033_v40 = vmax.f32 %v996_v43, 0.0  ;;  %v966_v15 = vpop.f32.mrf.mxu2 }
 0x18e   : > { %v967_v26 = vadd.f32 %v966_v15, %v4247_v21 }
 0x192   : > { %v997_v45 = vpop.f32.mrf.mxu3 }
 0x193   : > { %v998_v44 = vadd.f32 %v997_v45, %v949_v27  ;;  %1243 = vmatmul.bf16.gmra.mxu0 %v1066_v13 }
 0x195   : > { %v1035_v12 = vmax.f32 %v998_v44, 0.0  ;;  %v968_v28 = vpop.f32.mrf.mxu2 }
 0x196   : > { %v969_v29 = vadd.f32 %v968_v28, %v4247_v21 }
 0x197   : > { %v1059_v61 = vpack.c.bf16 %v1035_v12, %v1033_v40 }
 0x199   : > { %1272 = vmatmul.bf16.gmra.mxu1 %v1059_v61 }
 0x19a   : > { %v1000_v48 = vpop.f32.mrf.mxu3 }
 0x19b   : > { %v1001_v52 = vadd.f32 %v1000_v48, %v952_v50  ;;  %v3220_v48 = vld [vmem:[#allocation11 + $0x30] sm:$0xff] }
 0x19c   : > { %1532 = vmatpush.bf16.msra.mxu3 %v3220_v48 }
 0x19d   : > { %v1037_v31 = vmax.f32 %v1001_v52, 0.0 }
 0x1a0   : > { %v1209_v22 = vpop.f32.mrf.mxu0  ;;  %1533 = vmatpush.bf16.msra.mxu3 %v3219_v63 }
 0x1a1   : > { %v1210_v27 = vadd.f32 %v4278_v41, %v1209_v22 }
 0x1a2   : > { %v1002_v53 = vpop.f32.mrf.mxu3 }
 0x1a3   : > { %v1003_v54 = vadd.f32 %v1002_v53, %v954_v51 }
 0x1a4   : > { %1534 = vmatpush.bf16.msra.mxu3 %v3218_v10 }
 0x1a5   : > { %v1039_v59 = vmax.f32 %v1003_v54, 0.0 }
 0x1a7   : > { %v1061_v62 = vpack.c.bf16 %v1039_v59, %v1037_v31 }
 0x1a8   : > { %v1211_v9 = vpop.f32.mrf.mxu0 }
 0x1a9   : > { %1277 = vmatmul.bf16.gmra.mxu1 %v1061_v62  ;;  %v1212_v43 = vadd.f32 %v4278_v41, %v1211_v9 }
 0x1aa   : > { %v1005_v0 = vpop.f32.mrf.mxu3 }
 0x1ab   : > { %v1006_v4 = vadd.f32 %v1005_v0, %v957_v1 }
 0x1ad   : > { %v1041_v55 = vmax.f32 %v1006_v4, 0.0 }
 0x1b0   : > { %v1214_v37 = vpop.f32.mrf.mxu0 }
 0x1b1   : > { %v1215_v49 = vadd.f32 %v4278_v41, %v1214_v37 }
 0x1b2   : > { %v1007_v56 = vpop.f32.mrf.mxu3 }
 0x1b3   : > { %v1008_v6 = vadd.f32 %v1007_v56, %v959_v3 }
 0x1b5   : > { %v1043_v7 = vmax.f32 %v1008_v6, 0.0 }
 0x1b7   : > { %v1063_v8 = vpack.c.bf16 %v1043_v7, %v1041_v55 }
 0x1b8   : > { %v1216_v38 = vpop.f32.mrf.mxu0 }
 0x1b9   : > { %1282 = vmatmul.bf16.gmra.mxu1 %v1063_v8  ;;  %v1217_v50 = vadd.f32 %v4278_v41, %v1216_v38 }
 0x1ba   : > { %v1010_v16 = vpop.f32.mrf.mxu3 }
 0x1bb   : > { %v1011_v19 = vadd.f32 %v1010_v16, %v962_v17 }
 0x1bd   : > { %v1045_v20 = vmax.f32 %v1011_v19, 0.0 }
 0x1c0   : > { %v1219_v21 = vpop.f32.mrf.mxu0 }
 0x1c1   : > { %v1220_v1 = vadd.f32 %v4278_v41, %v1219_v21 }
 0x1c2   : > { %v1012_v57 = vpop.f32.mrf.mxu3 }
 0x1c3   : > { %v1013_v58 = vadd.f32 %v1012_v57, %v964_v18 }
 0x1c5   : > { %v1047_v23 = vmax.f32 %v1013_v58, 0.0 }
 0x1c7   : > { %v1065_v24 = vpack.c.bf16 %v1047_v23, %v1045_v20 }
 0x1c8   : > { %v1221_v61 = vpop.f32.mrf.mxu0 }
 0x1c9   : > { %1287 = vmatmul.bf16.gmra.mxu1 %v1065_v24  ;;  %v1222_v2 = vadd.f32 %v4278_v41, %v1221_v61  ;;  %v3217_v24 = vld [vmem:[#allocation11 + $0x18] sm:$0xff] }
 0x1ca   : > { %v1015_v25 = vpop.f32.mrf.mxu3  ;;  %1535 = vmatpush.bf16.msra.mxu3 %v3217_v24 }
 0x1cb   : > { %v1016_v30 = vadd.f32 %v1015_v25, %v967_v26 }
 0x1cd   : > { %v1049_v34 = vmax.f32 %v1016_v30, 0.0 }
 0x1d0   : > { %v1224_v54 = vpop.f32.mrf.mxu0 }
 0x1d1   : > { %v1225_v14 = vadd.f32 %v4278_v41, %v1224_v54 }
 0x1d2   : > { %v1017_v32 = vpop.f32.mrf.mxu3 }
 0x1d3   : > { %v1018_v33 = vadd.f32 %v1017_v32, %v969_v29 }
 0x1d5   : > { %v1051_v35 = vmax.f32 %v1018_v33, 0.0 }
 0x1d7   : > { %v1067_v36 = vpack.c.bf16 %v1051_v35, %v1049_v34  ;;  %v3216_v35 = vld [vmem:[#allocation11 + $0x10] sm:$0xff] }
 0x1d8   : > { %v1226_v0 = vpop.f32.mrf.mxu0  ;;  %1536 = vmatpush.bf16.msra.mxu3 %v3216_v35 }
 0x1d9   : > { %1292 = vmatmul.bf16.gmra.mxu1 %v1067_v36  ;;  %v1227_v16 = vadd.f32 %v4278_v41, %v1226_v0 }
 0x1e0   : > { %v1229_v7 = vpop.f32.mrf.mxu0 }
 0x1e1   : > { %v1230_v11 = vadd.f32 %v4278_v41, %v1229_v7 }
 0x1e6   : > { %v1258_v39 = vpop.f32.mrf.mxu1 }
 0x1e7   : > { %v1259_v13 = vadd.f32 %v1258_v39, %v1210_v27 }
 0x1e8   : > { %v1231_v18 = vpop.f32.mrf.mxu0 }
 0x1e9   : > { %v1298_v44 = vmax.f32 %v1259_v13, 0.0  ;;  %v1232_v25 = vadd.f32 %v4278_v41, %v1231_v18 }
 0x1ee   : > { %v1260_v45 = vpop.f32.mrf.mxu1 }
 0x1ef   : > { %v1261_v46 = vadd.f32 %v1260_v45, %v1212_v43  ;;  %v3215_v45 = vld [vmem:[#allocation11 + $0x8] sm:$0xff] }
 0x1f0   : > { %v1234_v23 = vpop.f32.mrf.mxu0  ;;  %1537 = vmatpush.bf16.msra.mxu3 %v3215_v45 }
 0x1f1   : > { %v1299_v40 = vmax.f32 %v1261_v46, 0.0  ;;  %v1235_v36 = vadd.f32 %v4278_v41, %v1234_v23 }
 0x1f3   : > { %v1314_v12 = vpack.c.bf16 %v1299_v40, %v1298_v44  ;;  %v3214_v40 = vld [vmem:[#allocation11] sm:$0xff] }
 0x1f4   : > { %1538 = vmatpush.bf16.msra.mxu3 %v3214_v40 }
 0x1f5   : > { %1398 = vmatmul.bf16.vlgmr.msrb.gmra.mxu2 %v1314_v12 }
 0x1f6   : > { %v1263_v47 = vpop.f32.mrf.mxu1 }
 0x1f7   : > { %v1264_v51 = vadd.f32 %v1263_v47, %v1215_v49 }
 0x1f8   : > { %v1236_v32 = vpop.f32.mrf.mxu0 }
 0x1f9   : > { %v1300_v31 = vmax.f32 %v1264_v51, 0.0  ;;  %v1237_v38 = vadd.f32 %v4278_v41, %v1236_v32 }
 0x1fe   : > { %v1265_v52 = vpop.f32.mrf.mxu1 }
 0x1ff   : > { %v1266_v53 = vadd.f32 %v1265_v52, %v1217_v50 }
 0x200   : > { %v1239_v37 = vpop.f32.mrf.mxu0 }
 0x201   : > { %v1301_v59 = vmax.f32 %v1266_v53, 0.0  ;;  %v1240_v12 = vadd.f32 %v4278_v41, %v1239_v37 }
 0x203   : > { %v1315_v60 = vpack.c.bf16 %v1301_v59, %v1300_v31 }
 0x205   : > { %1403 = vmatmul.bf16.gmra.mxu2 %v1315_v60 }
 0x206   : > { %v1268_v62 = vpop.f32.mrf.mxu1 }
 0x207   : > { %v1269_v3 = vadd.f32 %v1268_v62, %v1220_v1 }
 0x208   : > { %v1241_v46 = vpop.f32.mrf.mxu0 }
 0x209   : > { %v1302_v56 = vmax.f32 %v1269_v3, 0.0  ;;  %v1242_v61 = vadd.f32 %v4278_v41, %v1241_v46  ;;  %v3224_v46 = vld [vmem:[#allocation13 + $0x10] sm:$0xff] }
 0x20e   : > { %v1270_v4 = vpop.f32.mrf.mxu1 }
 0x20f   : > { %v1271_v5 = vadd.f32 %v1270_v4, %v1222_v2 }
 0x210   : > { %v1244_v50 = vpop.f32.mrf.mxu0 }
 0x211   : > { %v1303_v6 = vmax.f32 %v1271_v5, 0.0  ;;  %v1245_v59 = vadd.f32 %v4278_v41, %v1244_v50  ;;  %v4299_v5 = vld [vmem:[%s4972_s6] ss:$0 sm:$0xff] }
 0x213   : > { %v1316_v55 = vpack.c.bf16 %v1303_v6, %v1302_v56  ;;  %v3229_v56 = vld [vmem:[#allocation13 + $0x38] sm:$0xff] }
 0x214   : > { %1672 = vmatpush.bf16.msra.mxu0 %v3229_v56  ;;  %v3244_v56 = vld [vmem:[#allocation14 + $0x74] sm:$0xf] }
 0x215   : > { %1408 = vmatmul.bf16.gmra.mxu2 %v1316_v55 }
 0x216   : > { %v1273_v8 = vpop.f32.mrf.mxu1 }
 0x217   : > { %v1274_v17 = vadd.f32 %v1273_v8, %v1225_v14 }
 0x218   : > { %v1246_v31 = vpop.f32.mrf.mxu0 }
 0x219   : > { %v1304_v58 = vmax.f32 %v1274_v17, 0.0  ;;  %v1247_v60 = vadd.f32 %v4278_v41, %v1246_v31 }
 0x21e   : > { %v1275_v19 = vpop.f32.mrf.mxu1 }
 0x21f   : > { %v1276_v57 = vadd.f32 %v1275_v19, %v1227_v16  ;;  %v3228_v16 = vld [vmem:[#allocation13 + $0x30] sm:$0xff] }
 0x220   : > { %1673 = vmatpush.bf16.msra.mxu0 %v3228_v16 }
 0x221   : > { %v1305_v22 = vmax.f32 %v1276_v57, 0.0 }
 0x223   : > { %v1317_v15 = vpack.c.bf16 %v1305_v22, %v1304_v58 }
 0x225   : > { %1413 = vmatmul.bf16.gmra.mxu2 %v1317_v15 }
 0x226   : > { %v1278_v20 = vpop.f32.mrf.mxu1 }
 0x227   : > { %v1279_v26 = vadd.f32 %v1278_v20, %v1230_v11  ;;  %v3227_v20 = vld [vmem:[#allocation13 + $0x28] sm:$0xff] }
 0x228   : > { %1674 = vmatpush.bf16.msra.mxu0 %v3227_v20 }
 0x229   : > { %v1306_v29 = vmax.f32 %v1279_v26, 0.0 }
 0x22e   : > { %v1280_v9 = vpop.f32.mrf.mxu1 }
 0x22f   : > { %v1281_v28 = vadd.f32 %v1280_v9, %v1232_v25 }
 0x231   : > { %v1307_v30 = vmax.f32 %v1281_v28, 0.0 }
 0x233   : > { %v1318_v33 = vpack.c.bf16 %v1307_v30, %v1306_v29  ;;  %v3226_v29 = vld [vmem:[#allocation13 + $0x20] sm:$0xff] }
 0x234   : > { %1675 = vmatpush.bf16.msra.mxu0 %v3226_v29 }
 0x235   : > { %1418 = vmatmul.bf16.gmra.mxu2 %v1318_v33 }
 0x236   : > { %v1283_v34 = vpop.f32.mrf.mxu1 }
 0x237   : > { %v1284_v39 = vadd.f32 %v1283_v34, %v1235_v36 }
 0x239   : > { %v1308_v21 = vmax.f32 %v1284_v39, 0.0 }
 0x23e   : > { %v1285_v42 = vpop.f32.mrf.mxu1 }
 0x23f   : > { %v1286_v27 = vadd.f32 %v1285_v42, %v1237_v38  ;;  %v3225_v38 = vld [vmem:[#allocation13 + $0x18] sm:$0xff] }
 0x240   : > { %1676 = vmatpush.bf16.msra.mxu0 %v3225_v38 }
 0x241   : > { %v1309_v43 = vmax.f32 %v1286_v27, 0.0 }
 0x243   : > { %v1319_v13 = vpack.c.bf16 %v1309_v43, %v1308_v21 }
 0x244   : > { %1677 = vmatpush.bf16.msra.mxu0 %v3224_v46  ;;  %v3090_v46 = vld [vmem:[#allocation14 + $0x48] sm:$0xf0] }
 0x245   : > { %1423 = vmatmul.bf16.gmra.mxu2 %v1319_v13 }
 0x246   : > { %v1288_v44 = vpop.f32.mrf.mxu1 }
 0x247   : > { %v1289_v47 = vadd.f32 %v1288_v44, %v1240_v12 }
 0x249   : > { %v1310_v51 = vmax.f32 %v1289_v47, 0.0 }
 0x24e   : > { %v1290_v48 = vpop.f32.mrf.mxu1 }
 0x24f   : > { %v1291_v49 = vadd.f32 %v1290_v48, %v1242_v61 }
 0x251   : > { %v1311_v52 = vmax.f32 %v1291_v49, 0.0  ;;  %v3223_v49 = vld [vmem:[#allocation13 + $0x8] sm:$0xff] }
 0x252   : > { %1678 = vmatpush.bf16.msra.mxu0 %v3223_v49 }
 0x253   : > { %v1320_v53 = vpack.c.bf16 %v1311_v52, %v1310_v51  ;;  %v3222_v51 = vld [vmem:[#allocation13] sm:$0xff] }
 0x255   : > { %1428 = vmatmul.bf16.gmra.mxu2 %v1320_v53 }
 0x256   : > { %v1293_v54 = vpop.f32.mrf.mxu1  ;;  %1679 = vmatpush.bf16.msra.mxu0 %v3222_v51 }
 0x257   : > { %v1294_v62 = vadd.f32 %v1293_v54, %v1245_v59 }
 0x259   : > { %v1312_v1 = vmax.f32 %v1294_v62, 0.0 }
 0x25e   : > { %v1295_v63 = vpop.f32.mrf.mxu1 }
 0x25f   : > { %v1296_v0 = vadd.f32 %v1295_v63, %v1247_v60 }
 0x261   : > { %v1313_v2 = vmax.f32 %v1296_v0, 0.0 }
 0x263   : > { %v1321_v3 = vpack.c.bf16 %v1313_v2, %v1312_v1 }
 0x265   : > { %1433 = vmatmul.bf16.gmra.mxu2 %v1321_v3 }
 0x278   : > { %v1399_v4 = vpop.f32.mrf.mxu2 }
 0x279   : > { %v1400_v6 = vadd.f32 %v4299_v5, %v1399_v4 }
 0x27b   : > { %v1439_v7 = vmax.f32 %v1400_v6, 0.0  ;;  %v3114_v6 = vld [vmem:[#allocation14 + $0x78] sm:$0xf0] }
 0x280   : > { %v1401_v55 = vpop.f32.mrf.mxu2 }
 0x281   : > { %v1402_v41 = vadd.f32 %v4299_v5, %v1401_v55  ;;  %v3117_v55 = vor.u32 %v3244_v56, %v3114_v6 }
 0x283   : > { %v1440_v8 = vmax.f32 %v1402_v41, 0.0  ;;  %1896 = vmatpush.bf16.msra.mxu2 %v3117_v55  ;;  %v3234_v55 = vld [vmem:[#allocation14 + $0x24] sm:$0xf] }
 0x285   : > { %v1455_v10 = vpack.c.bf16 %v1440_v8, %v1439_v7  ;;  %v4320_v7 = vld [vmem:[%s4974_s8] ss:$0 sm:$0xff]  ;;  %v3112_v8 = vld [vmem:[#allocation14 + $0x70] sm:$0xf] }
 0x287   : > { %1539 = vmatmul.bf16.vlgmr.msra.gmra.mxu3 %v1455_v10  ;;  %v3245_v10 = vld [vmem:[#allocation14 + $0x74] sm:$0xf0] }
 0x288   : > { %v1404_v14 = vpop.f32.mrf.mxu2 }
 0x289   : > { %v1405_v17 = vadd.f32 %v4299_v5, %v1404_v14  ;;  %v3113_v14 = vor.u32 %v3245_v10, %v3112_v8 }
 0x28b   : > { %v1441_v57 = vmax.f32 %v1405_v17, 0.0  ;;  %1847 = vmatpush.bf16.msra.mxu1 %v3113_v14  ;;  %v3072_v14 = vld [vmem:[#allocation14 + $0x20] sm:$0xf] }
 0x290   : > { %v1406_v18 = vpop.f32.mrf.mxu2 }
 0x291   : > { %v1407_v19 = vadd.f32 %v4299_v5, %v1406_v18 }
 0x293   : > { %v1442_v58 = vmax.f32 %v1407_v19, 0.0 }
 0x295   : > { %v1456_v22 = vpack.c.bf16 %v1442_v58, %v1441_v57  ;;  %v3242_v58 = vld [vmem:[#allocation14 + $0x64] sm:$0xf] }
 0x297   : > { %1544 = vmatmul.bf16.gmra.mxu3 %v1456_v22  ;;  %v3106_v22 = vld [vmem:[#allocation14 + $0x68] sm:$0xf0] }
 0x298   : > { %v1409_v15 = vpop.f32.mrf.mxu2 }
 0x299   : > { %v1410_v23 = vadd.f32 %v4299_v5, %v1409_v15  ;;  %v3109_v15 = vor.u32 %v3242_v58, %v3106_v22 }
 0x29b   : > { %v1443_v25 = vmax.f32 %v1410_v23, 0.0  ;;  %1897 = vmatpush.bf16.msra.mxu2 %v3109_v15  ;;  %v3104_v23 = vld [vmem:[#allocation14 + $0x60] sm:$0xf]  ;;  %v3232_v15 = vld [vmem:[#allocation14 + $0x14] sm:$0xf] }
 0x2a0   : > { %v1411_v24 = vpop.f32.mrf.mxu2 }
 0x2a1   : > { %v1412_v11 = vadd.f32 %v4299_v5, %v1411_v24  ;;  %v3243_v24 = vld [vmem:[#allocation14 + $0x64] sm:$0xf0] }
 0x2a3   : > { %v1444_v26 = vmax.f32 %v1412_v11, 0.0  ;;  %v3105_v11 = vor.u32 %v3243_v24, %v3104_v23  ;;  %v3064_v24 = vld [vmem:[#allocation14 + $0x10] sm:$0xf] }
 0x2a5   : > { %v1457_v9 = vpack.c.bf16 %v1444_v26, %v1443_v25  ;;  %1848 = vmatpush.bf16.msra.mxu1 %v3105_v11  ;;  %v3233_v11 = vld [vmem:[#allocation14 + $0x14] sm:$0xf0] }
 0x2a7   : > { %1549 = vmatmul.bf16.gmra.mxu3 %v1457_v9 }
 0x2a8   : > { %v1414_v28 = vpop.f32.mrf.mxu2 }
 0x2a9   : > { %v1415_v30 = vadd.f32 %v4299_v5, %v1414_v28 }
 0x2ab   : > { %v1445_v34 = vmax.f32 %v1415_v30, 0.0 }
 0x2b0   : > { %v1416_v32 = vpop.f32.mrf.mxu2 }
 0x2b1   : > { %v1417_v33 = vadd.f32 %v4299_v5, %v1416_v32  ;;  %v3240_v32 = vld [vmem:[#allocation14 + $0x54] sm:$0xf] }
 0x2b3   : > { %v1446_v35 = vmax.f32 %v1417_v33, 0.0  ;;  %v3098_v33 = vld [vmem:[#allocation14 + $0x58] sm:$0xf0] }
 0x2b5   : > { %v1458_v36 = vpack.c.bf16 %v1446_v35, %v1445_v34  ;;  %v3101_v34 = vor.u32 %v3240_v32, %v3098_v33 }
 0x2b7   : > { %1554 = vmatmul.bf16.gmra.mxu3 %v1458_v36  ;;  %1898 = vmatpush.bf16.msra.mxu2 %v3101_v34  ;;  %v3096_v36 = vld [vmem:[#allocation14 + $0x50] sm:$0xf] }
 0x2b8   : > { %v1419_v37 = vpop.f32.mrf.mxu2 }
 0x2b9   : > { %v1420_v39 = vadd.f32 %v4299_v5, %v1419_v37  ;;  %v3241_v37 = vld [vmem:[#allocation14 + $0x54] sm:$0xf0] }
 0x2ba   : > { %v3097_v38 = vor.u32 %v3241_v37, %v3096_v36  ;;  %v3056_v37 = vld [vmem:[#allocation14] sm:$0xf] }
 0x2bb   : > { %v1447_v21 = vmax.f32 %v1420_v39, 0.0 }
 0x2bc   : > { %1849 = vmatpush.bf16.msra.mxu1 %v3097_v38  ;;  %v3231_v38 = vld [vmem:[#allocation14 + $0x4] sm:$0xf0] }
 0x2c0   : > { %v1421_v42 = vpop.f32.mrf.mxu2 }
 0x2c1   : > { %v1422_v27 = vadd.f32 %v4299_v5, %v1421_v42 }
 0x2c3   : > { %v1448_v43 = vmax.f32 %v1422_v27, 0.0 }
 0x2c5   : > { %v1459_v13 = vpack.c.bf16 %v1448_v43, %v1447_v21 }
 0x2c7   : > { %1559 = vmatmul.bf16.gmra.mxu3 %v1459_v13 }
 0x2c8   : > { %v1424_v45 = vpop.f32.mrf.mxu2 }
 0x2c9   : > { %v1425_v44 = vadd.f32 %v4299_v5, %v1424_v45  ;;  %v3238_v45 = vld [vmem:[#allocation14 + $0x44] sm:$0xf] }
 0x2cb   : > { %v1449_v61 = vmax.f32 %v1425_v44, 0.0  ;;  %v3093_v44 = vor.u32 %v3238_v45, %v3090_v46 }
 0x2cd   : > { %1899 = vmatpush.bf16.msra.mxu2 %v3093_v44 }
 0x2d0   : > { %v1426_v40 = vpop.f32.mrf.mxu2 }
 0x2d1   : > { %v1427_v12 = vadd.f32 %v4299_v5, %v1426_v40 }
 0x2d3   : > { %v1450_v47 = vmax.f32 %v1427_v12, 0.0  ;;  %v3088_v12 = vld [vmem:[#allocation14 + $0x40] sm:$0xf] }
 0x2d5   : > { %v1460_v48 = vpack.c.bf16 %v1450_v47, %v1449_v61  ;;  %v3239_v61 = vld [vmem:[#allocation14 + $0x44] sm:$0xf0] }
 0x2d6   : > { %v3089_v47 = vor.u32 %v3239_v61, %v3088_v12 }
 0x2d7   : > { %1564 = vmatmul.bf16.gmra.mxu3 %v1460_v48 }
 0x2d8   : > { %v1429_v50 = vpop.f32.mrf.mxu2  ;;  %1850 = vmatpush.bf16.msra.mxu1 %v3089_v47 }
 0x2d9   : > { %v1430_v52 = vadd.f32 %v4299_v5, %v1429_v50 }
 0x2db   : > { %v1451_v31 = vmax.f32 %v1430_v52, 0.0 }
 0x2e0   : > { %v1431_v53 = vpop.f32.mrf.mxu2 }
 0x2e1   : > { %v1432_v54 = vadd.f32 %v4299_v5, %v1431_v53 }
 0x2e3   : > { %v1452_v59 = vmax.f32 %v1432_v54, 0.0  ;;  %v3236_v54 = vld [vmem:[#allocation14 + $0x34] sm:$0xf] }
 0x2e5   : > { %v1461_v60 = vpack.c.bf16 %v1452_v59, %v1451_v31  ;;  %v3082_v31 = vld [vmem:[#allocation14 + $0x38] sm:$0xf0] }
 0x2e6   : > { %v3085_v59 = vor.u32 %v3236_v54, %v3082_v31 }
 0x2e7   : > { %1569 = vmatmul.bf16.gmra.mxu3 %v1461_v60 }
 0x2e8   : > { %v1434_v62 = vpop.f32.mrf.mxu2  ;;  %1900 = vmatpush.bf16.msra.mxu2 %v3085_v59 }
 0x2e9   : > { %v1435_v63 = vadd.f32 %v4299_v5, %v1434_v62  ;;  %v3080_v62 = vld [vmem:[#allocation14 + $0x30] sm:$0xf] }
 0x2eb   : > { %v1453_v2 = vmax.f32 %v1435_v63, 0.0  ;;  %v3237_v63 = vld [vmem:[#allocation14 + $0x34] sm:$0xf0] }
 0x2f0   : > { %v1436_v0 = vpop.f32.mrf.mxu2 }
 0x2f1   : > { %v1437_v1 = vadd.f32 %v4299_v5, %v1436_v0  ;;  %v3081_v0 = vor.u32 %v3237_v63, %v3080_v62 }
 0x2f3   : > { %v1454_v3 = vmax.f32 %v1437_v1, 0.0  ;;  %1851 = vmatpush.bf16.msra.mxu1 %v3081_v0 }
 0x2f5   : > { %v1462_v4 = vpack.c.bf16 %v1454_v3, %v1453_v2 }
 0x2f7   : > { %1574 = vmatmul.bf16.gmra.mxu3 %v1462_v4 }
 0x30a   : > { %v1540_v41 = vpop.f32.mrf.mxu3 }
 0x30b   : > { %v1541_v5 = vadd.f32 %v4320_v7, %v1540_v41  ;;  %v3074_v41 = vld [vmem:[#allocation14 + $0x28] sm:$0xf0] }
 0x30c   : > { %v3077_v8 = vor.u32 %v3234_v55, %v3074_v41 }
 0x30d   : > { %v1580_v18 = vmax.f32 %v1541_v5, 0.0  ;;  %v3235_v5 = vld [vmem:[#allocation14 + $0x24] sm:$0xf0] }
 0x30e   : > { %1901 = vmatpush.bf16.msra.mxu2 %v3077_v8 }
 0x312   : > { %v1542_v16 = vpop.f32.mrf.mxu3 }
 0x313   : > { %v1543_v17 = vadd.f32 %v4320_v7, %v1542_v16  ;;  %v3073_v16 = vor.u32 %v3235_v5, %v3072_v14 }
 0x315   : > { %v1581_v19 = vmax.f32 %v1543_v17, 0.0  ;;  %1852 = vmatpush.bf16.msra.mxu1 %v3073_v16 }
 0x317   : > { %v1596_v57 = vpack.c.bf16 %v1581_v19, %v1580_v18 }
 0x319   : > { %1680 = vmatmul.bf16.vlgmr.msra.gmra.mxu0 %v1596_v57 }
 0x31a   : > { %v1545_v20 = vpop.f32.mrf.mxu3 }
 0x31b   : > { %v1546_v25 = vadd.f32 %v4320_v7, %v1545_v20  ;;  %v3066_v20 = vld [vmem:[#allocation14 + $0x18] sm:$0xf0] }
 0x31c   : > { %v3069_v23 = vor.u32 %v3232_v15, %v3066_v20 }
 0x31d   : > { %v1582_v28 = vmax.f32 %v1546_v25, 0.0  ;;  %v3230_v25 = vld [vmem:[#allocation14 + $0x4] sm:$0xf] }
 0x31e   : > { %1902 = vmatpush.bf16.msra.mxu2 %v3069_v23 }
 0x322   : > { %v1547_v26 = vpop.f32.mrf.mxu3 }
 0x323   : > { %v1548_v9 = vadd.f32 %v4320_v7, %v1547_v26 }
 0x325   : > { %v1583_v29 = vmax.f32 %v1548_v9, 0.0  ;;  %v3065_v9 = vor.u32 %v3233_v11, %v3064_v24 }
 0x327   : > { %v1597_v30 = vpack.c.bf16 %v1583_v29, %v1582_v28  ;;  %v3058_v28 = vld [vmem:[#allocation14 + $0x8] sm:$0xf0]  ;;  %1853 = vmatpush.bf16.msra.mxu1 %v3065_v9 }
 0x328   : > { %v3061_v29 = vor.u32 %v3230_v25, %v3058_v28 }
 0x329   : > { %1685 = vmatmul.bf16.gmra.mxu0 %v1597_v30 }
 0x32a   : > { %v1550_v35 = vpop.f32.mrf.mxu3  ;;  %1903 = vmatpush.bf16.msra.mxu2 %v3061_v29 }
 0x32b   : > { %v1551_v39 = vadd.f32 %v4320_v7, %v1550_v35 }
 0x32d   : > { %v1584_v21 = vmax.f32 %v1551_v39, 0.0 }
 0x332   : > { %v1552_v42 = vpop.f32.mrf.mxu3 }
 0x333   : > { %v1553_v27 = vadd.f32 %v4320_v7, %v1552_v42  ;;  %v3057_v42 = vor.u32 %v3231_v38, %v3056_v37 }
 0x335   : > { %v1585_v43 = vmax.f32 %v1553_v27, 0.0  ;;  %1854 = vmatpush.bf16.msra.mxu1 %v3057_v42  ;;  %v1761_v42 = vld [vmem:[%s5006_s23] sm:$0x3] }
 0x337   : > { %v1598_v13 = vpack.c.bf16 %v1585_v43, %v1584_v21 }
 0x339   : > { %1690 = vmatmul.bf16.gmra.mxu0 %v1598_v13 }
 0x33a   : > { %v1555_v40 = vpop.f32.mrf.mxu3 }
 0x33b   : > { %v1556_v48 = vadd.f32 %v4320_v7, %v1555_v40  ;;  %v4341_v40 = vld [vmem:[%s4976_s10] ss:$0 sm:$0xff] }
 0x33d   : > { %v1586_v51 = vmax.f32 %v1556_v48, 0.0 }
 0x342   : > { %v1557_v49 = vpop.f32.mrf.mxu3 }
 0x343   : > { %v1558_v50 = vadd.f32 %v4320_v7, %v1557_v49 }
 0x345   : > { %v1587_v52 = vmax.f32 %v1558_v50, 0.0 }
 0x347   : > { %v1599_v53 = vpack.c.bf16 %v1587_v52, %v1586_v51 }
 0x349   : > { %1695 = vmatmul.bf16.gmra.mxu0 %v1599_v53 }
 0x34a   : > { %v1560_v60 = vpop.f32.mrf.mxu3 }
 0x34b   : > { %v1561_v1 = vadd.f32 %v4320_v7, %v1560_v60 }
 0x34d   : > { %v1588_v4 = vmax.f32 %v1561_v1, 0.0 }
 0x352   : > { %v1562_v2 = vpop.f32.mrf.mxu3 }
 0x353   : > { %v1563_v3 = vadd.f32 %v4320_v7, %v1562_v2 }
 0x355   : > { %v1589_v56 = vmax.f32 %v1563_v3, 0.0 }
 0x357   : > { %v1600_v6 = vpack.c.bf16 %v1589_v56, %v1588_v4 }
 0x359   : > { %1700 = vmatmul.bf16.gmra.mxu0 %v1600_v6 }
 0x35a   : > { %v1565_v10 = vpop.f32.mrf.mxu3 }
 0x35b   : > { %v1566_v17 = vadd.f32 %v4320_v7, %v1565_v10 }
 0x35d   : > { %v1590_v57 = vmax.f32 %v1566_v17, 0.0 }
 0x362   : > { %v1567_v18 = vpop.f32.mrf.mxu3 }
 0x363   : > { %v1568_v19 = vadd.f32 %v4320_v7, %v1567_v18 }
 0x365   : > { %v1591_v58 = vmax.f32 %v1568_v19, 0.0 }
 0x367   : > { %v1601_v22 = vpack.c.bf16 %v1591_v58, %v1590_v57 }
 0x369   : > { %1705 = vmatmul.bf16.gmra.mxu0 %v1601_v22 }
 0x36a   : > { %v1570_v26 = vpop.f32.mrf.mxu3 }
 0x36b   : > { %v1571_v30 = vadd.f32 %v4320_v7, %v1570_v26 }
 0x36d   : > { %v1592_v34 = vmax.f32 %v1571_v30, 0.0 }
 0x372   : > { %v1572_v32 = vpop.f32.mrf.mxu3 }
 0x373   : > { %v1573_v33 = vadd.f32 %v4320_v7, %v1572_v32 }
 0x375   : > { %v1593_v35 = vmax.f32 %v1573_v33, 0.0 }
 0x377   : > { %v1602_v36 = vpack.c.bf16 %v1593_v35, %v1592_v34 }
 0x379   : > { %1710 = vmatmul.bf16.gmra.mxu0 %v1602_v36 }
 0x37a   : > { %v1575_v39 = vpop.f32.mrf.mxu3 }
 0x37b   : > { %v1576_v27 = vadd.f32 %v4320_v7, %v1575_v39 }
 0x37d   : > { %v1594_v13 = vmax.f32 %v1576_v27, 0.0  ;;  %v4362_v27 = vperm.slane %v1761_v42, 0 }
 0x382   : > { %v1577_v21 = vpop.f32.mrf.mxu3 }
 0x383   : > { %v1578_v43 = vadd.f32 %v4320_v7, %v1577_v21 }
 0x385   : > { %v1595_v45 = vmax.f32 %v1578_v43, 0.0 }
 0x387   : > { %v1603_v46 = vpack.c.bf16 %v1595_v45, %v1594_v13  ;;  %v4365_v45 = vperm.slane %v1761_v42, 1 }
 0x389   : > { %1715 = vmatmul.bf16.gmra.mxu0 %v1603_v46 }
 0x396   : > { %v1681_v44 = vpop.f32.mrf.mxu0 }
 0x397   : > { %v1682_v12 = vadd.f32 %v4341_v40, %v1681_v44 }
 0x399   : > { %v1721_v48 = vmax.f32 %v1682_v12, 0.0 }
 0x39e   : > { %v1683_v61 = vpop.f32.mrf.mxu0 }
 0x39f   : > { %v1684_v47 = vadd.f32 %v4341_v40, %v1683_v61 }
 0x3a1   : > { %v1722_v49 = vmax.f32 %v1684_v47, 0.0 }
 0x3a3   : > { %v1737_v50 = vpack.c.bf16 %v1722_v49, %v1721_v48 }
 0x3a5   : > { %1855 = vmatmul.bf16.vlgmr.msra.gmra.mxu1 %v1737_v50  ;;  %1904 = vmatmul.bf16.vlgmr.msra.gmra.mxu2 %v1737_v50 }
 0x3a6   : > { %v1686_v7 = vpop.f32.mrf.mxu0 }
 0x3a7   : > { %v1687_v51 = vadd.f32 %v4341_v40, %v1686_v7 }
 0x3a9   : > { %v1723_v54 = vmax.f32 %v1687_v51, 0.0 }
 0x3ae   : > { %v1688_v52 = vpop.f32.mrf.mxu0 }
 0x3af   : > { %v1689_v53 = vadd.f32 %v4341_v40, %v1688_v52 }
 0x3b1   : > { %v1724_v31 = vmax.f32 %v1689_v53, 0.0 }
 0x3b3   : > { %v1738_v59 = vpack.c.bf16 %v1724_v31, %v1723_v54 }
 0x3b5   : > { %1860 = vmatmul.bf16.gmra.mxu1 %v1738_v59  ;;  %1909 = vmatmul.bf16.gmra.mxu2 %v1738_v59 }
 0x3b6   : > { %v1691_v60 = vpop.f32.mrf.mxu0 }
 0x3b7   : > { %v1692_v62 = vadd.f32 %v4341_v40, %v1691_v60 }
 0x3b9   : > { %v1725_v1 = vmax.f32 %v1692_v62, 0.0 }
 0x3be   : > { %v1693_v63 = vpop.f32.mrf.mxu0 }
 0x3bf   : > { %v1694_v0 = vadd.f32 %v4341_v40, %v1693_v63 }
 0x3c1   : > { %v1726_v2 = vmax.f32 %v1694_v0, 0.0 }
 0x3c3   : > { %v1739_v3 = vpack.c.bf16 %v1726_v2, %v1725_v1 }
 0x3c5   : > { %1865 = vmatmul.bf16.gmra.mxu1 %v1739_v3  ;;  %1914 = vmatmul.bf16.gmra.mxu2 %v1739_v3 }
 0x3c6   : > { %v1696_v4 = vpop.f32.mrf.mxu0 }
 0x3c7   : > { %v1697_v56 = vadd.f32 %v4341_v40, %v1696_v4 }
 0x3c9   : > { %v1727_v41 = vmax.f32 %v1697_v56, 0.0 }
 0x3ce   : > { %v1698_v6 = vpop.f32.mrf.mxu0 }
 0x3cf   : > { %v1699_v55 = vadd.f32 %v4341_v40, %v1698_v6 }
 0x3d1   : > { %v1728_v8 = vmax.f32 %v1699_v55, 0.0 }
 0x3d3   : > { %v1740_v10 = vpack.c.bf16 %v1728_v8, %v1727_v41 }
 0x3d5   : > { %1870 = vmatmul.bf16.gmra.mxu1 %v1740_v10  ;;  %1919 = vmatmul.bf16.gmra.mxu2 %v1740_v10 }
 0x3d6   : > { %v1701_v14 = vpop.f32.mrf.mxu0 }
 0x3d7   : > { %v1702_v5 = vadd.f32 %v4341_v40, %v1701_v14 }
 0x3d9   : > { %v1729_v18 = vmax.f32 %v1702_v5, 0.0 }
 0x3de   : > { %v1703_v16 = vpop.f32.mrf.mxu0 }
 0x3df   : > { %v1704_v17 = vadd.f32 %v4341_v40, %v1703_v16 }
 0x3e1   : > { %v1730_v19 = vmax.f32 %v1704_v17, 0.0 }
 0x3e3   : > { %v1741_v57 = vpack.c.bf16 %v1730_v19, %v1729_v18 }
 0x3e5   : > { %1875 = vmatmul.bf16.gmra.mxu1 %v1741_v57  ;;  %1924 = vmatmul.bf16.gmra.mxu2 %v1741_v57 }
 0x3e6   : > { %v1706_v58 = vpop.f32.mrf.mxu0 }
 0x3e7   : > { %v1707_v22 = vadd.f32 %v4341_v40, %v1706_v58 }
 0x3e9   : > { %v1731_v23 = vmax.f32 %v1707_v22, 0.0 }
 0x3ee   : > { %v1708_v15 = vpop.f32.mrf.mxu0 }
 0x3ef   : > { %v1709_v20 = vadd.f32 %v4341_v40, %v1708_v15 }
 0x3f1   : > { %v1732_v24 = vmax.f32 %v1709_v20, 0.0 }
 0x3f3   : > { %v1742_v11 = vpack.c.bf16 %v1732_v24, %v1731_v23 }
 0x3f5   : > { %1880 = vmatmul.bf16.gmra.mxu1 %v1742_v11  ;;  %1929 = vmatmul.bf16.gmra.mxu2 %v1742_v11 }
 0x3f6   : > { %v1711_v25 = vpop.f32.mrf.mxu0 }
 0x3f7   : > { %v1712_v26 = vadd.f32 %v4341_v40, %v1711_v25 }
 0x3f9   : > { %v1733_v29 = vmax.f32 %v1712_v26, 0.0 }
 0x3fe   : > { %v1713_v9 = vpop.f32.mrf.mxu0 }
 0x3ff   : > { %v1714_v28 = vadd.f32 %v4341_v40, %v1713_v9 }
 0x401   : > { %v1734_v30 = vmax.f32 %v1714_v28, 0.0 }
 0x403   : > { %v1743_v32 = vpack.c.bf16 %v1734_v30, %v1733_v29 }
 0x405   : > { %1885 = vmatmul.bf16.gmra.mxu1 %v1743_v32  ;;  %1934 = vmatmul.bf16.gmra.mxu2 %v1743_v32 }
 0x406   : > { %v1716_v33 = vpop.f32.mrf.mxu0 }
 0x407   : > { %v1717_v34 = vadd.f32 %v4341_v40, %v1716_v33 }
 0x409   : > { %v1735_v37 = vmax.f32 %v1717_v34, 0.0 }
 0x40e   : > { %v1718_v35 = vpop.f32.mrf.mxu0 }
 0x40f   : > { %v1719_v36 = vadd.f32 %v4341_v40, %v1718_v35 }
 0x411   : > { %v1736_v38 = vmax.f32 %v1719_v36, 0.0 }
 0x413   : > { %v1744_v39 = vpack.c.bf16 %v1736_v38, %v1735_v37 }
 0x415   : > { %1890 = vmatmul.bf16.gmra.mxu1 %v1744_v39  ;;  %1939 = vmatmul.bf16.gmra.mxu2 %v1744_v39 }
 0x422   : > { %v1856_v21 = vpop.f32.mrf.mxu1 }
 0x423   : > { %v1857_v43 = vadd.f32 %v1856_v21, %v4362_v27 }
 0x425   : > { %v3118_v13 = vmul.f32 -1.442695, %v1857_v43 }
 0x427   : > { %3401 = vpow2.f32 %v3118_v13 }
 0x428   : > { %v1905_v46 = vpop.f32.mrf.mxu2 }
 0x429   : > { %v1906_v44 = vadd.f32 %v1905_v46, %v4365_v45 }
 0x42a   : > { %v1858_v40 = vpop.f32.mrf.mxu1 }
 0x42b   : > { %v3119_v12 = vmul.f32 -1.442695, %v1906_v44  ;;  %v1859_v61 = vadd.f32 %v1858_v40, %v4362_v27 }
 0x42d   : > { %v3402_v47 = vpop.eup %3401  ;;  %3403 = vpow2.f32 %v3119_v12  ;;  %v3120_v48 = vmul.f32 -1.442695, %v1859_v61 }
 0x42e   : > { %v2041_v49 = vadd.f32 1.0, %v3402_v47 }
 0x42f   : > { %3405 = vpow2.f32 %v3120_v48 }
 0x430   : > { %3407 = vrcp.f32 %v2041_v49  ;;  %v1907_v50 = vpop.f32.mrf.mxu2  ;;  %v2082_v5 = vand.u32 2147483647, %v2041_v49  ;;  %v2084_v16 = vand.u32 2147483648, %v2041_v49  ;;  %vm2078_vm1 = vweird.f32 %v2041_v49 }
 0x431   : > { %v1908_v7 = vadd.f32 %v1907_v50, %v4365_v45 }
 0x432   : > { %v1861_v51 = vpop.f32.mrf.mxu1  ;;  %vm4389_vm3 = vcmp.eq.f32.partialorder %v2082_v5, 8.507059e+37  ;;  %v2085_v28 = vor.u32 1.1754944e-38, %v2084_v16 }
 0x433   : > { %v3404_v52 = vpop.eup %3403  ;;  %v3121_v53 = vmul.f32 -1.442695, %v1908_v7  ;;  %v1862_v54 = vadd.f32 %v1861_v51, %v4362_v27 }
 0x434   : > { %v2042_v31 = vadd.f32 1.0, %v3404_v52 }
 0x435   : > { %v3406_v59 = vpop.eup %3405  ;;  %3409 = vpow2.f32 %v3121_v53  ;;  %v3122_v60 = vmul.f32 -1.442695, %v1862_v54 }
 0x436   : > { %v3408_v62 = vpop.eup %3407  ;;  %3411 = vrcp.f32 %v2042_v31  ;;  %v4371_v0 = vadd.f32 1.0, %v3406_v59  ;;  %v2097_v15 = vand.u32 2147483647, %v2042_v31  ;;  %v2099_v20 = vand.u32 2147483648, %v2042_v31 }
 0x437   : > { %v2074_v63 = vmul.f32 %v3408_v62, %v2041_v49  ;;  %3413 = vpow2.f32 %v3122_v60  ;;  %vm2079_vm0 = vweird.f32 %v3408_v62  ;;  %vm2093_vm5 = vweird.f32 %v2042_v31 }
 0x438   : > { %v1910_v1 = vpop.f32.mrf.mxu2  ;;  %3415 = vrcp.f32 %v4371_v0  ;;  %vm4385_vm2 = vmor %vm2078_vm1, %vm2079_vm0  ;;  %vm2098_vm7 = vcmp.eq.f32.partialorder %v2097_v15, 8.507059e+37  ;;  %v2100_v36 = vor.u32 1.1754944e-38, %v2099_v20  ;;  %v2112_v38 = vand.u32 2147483647, %v4371_v0 }
 0x439   : > { %v2075_v2 = vsub.f32 1.0, %v2074_v63  ;;  %v1911_v3 = vadd.f32 %v1910_v1, %v4365_v45  ;;  %v2114_v50 = vand.u32 2147483648, %v4371_v0  ;;  %vm2108_vm9 = vweird.f32 %v4371_v0 }
 0x43a   : > { %v1863_v4 = vpop.f32.mrf.mxu1  ;;  %vm4428_vm12 = vcmp.eq.f32.partialorder %v2112_v38, 8.507059e+37 }
 0x43b   : > { %v3410_v56 = vpop.eup %3409  ;;  %v2076_v6 = vmul.f32 %v3408_v62, %v2075_v2  ;;  %v1864_v55 = vadd.f32 %v1863_v4, %v4362_v27  ;;  %v3123_v10 = vmul.f32 -1.442695, %v1911_v3  ;;  %v2115_v3 = vor.u32 1.1754944e-38, %v2114_v50 }
 0x43c   : > { %v3412_v41 = vpop.eup %3411  ;;  %v4376_v8 = vadd.f32 1.0, %v3410_v56 }
 0x43d   : > { %v3414_v14 = vpop.eup %3413  ;;  %v2089_v17 = vmul.f32 %v3412_v41, %v2042_v31  ;;  %v2077_v18 = vadd.f32 %v3408_v62, %v2076_v6  ;;  %v3124_v19 = vmul.f32 -1.442695, %v1864_v55  ;;  %vm2094_vm4 = vweird.f32 %v3412_v41 }
 0x43e   : > { %3417 = vrcp.f32 %v4376_v8  ;;  %v4379_v57 = vpop.eup %3415  ;;  %v4381_v22 = vadd.f32 1.0, %v3414_v14  ;;  %vm2095_vm6 = vmor %vm2093_vm5, %vm2094_vm4  ;;  %v2129_v7 = vand.u32 2147483648, %v4376_v8  ;;  %v2127_v54 = vand.u32 2147483647, %v4376_v8 }
 0x43f   : > { %v2090_v58 = vsub.f32 1.0, %v2089_v17  ;;  %3419 = vpow2.f32 %v3123_v10  ;;  %v2104_v23 = vmul.f32 %v4379_v57, %v4371_v0  ;;  %v2081_v9 = vsel %vm4385_vm2, %v3408_v62, %v2077_v18 }
 0x440   : > { %v1912_v24 = vpop.f32.mrf.mxu2  ;;  %3421 = vrcp.f32 %v4381_v22  ;;  %v2086_v42 = vsel %vm4389_vm3, %v2085_v28, %v2081_v9  ;;  %vm2109_vm8 = vweird.f32 %v4379_v57  ;;  %vm2123_vm13 = vweird.f32 %v4376_v8 }
 0x441   : > { %v2091_v26 = vmul.f32 %v3412_v41, %v2090_v58  ;;  %v2105_v29 = vsub.f32 1.0, %v2104_v23  ;;  %3423 = vpow2.f32 %v3124_v19  ;;  %v1913_v33 = vadd.f32 %v1912_v24, %v4365_v45  ;;  %vm4424_vm11 = vmor %vm2108_vm9, %vm2109_vm8 }
 0x442   : > { %v1866_v30 = vpop.f32.mrf.mxu1  ;;  %v2130_v4 = vor.u32 1.1754944e-38, %v2129_v7  ;;  %vm2128_vm15 = vcmp.eq.f32.partialorder %v2127_v54, 8.507059e+37  ;;  %v2144_v19 = vand.u32 2147483648, %v4381_v22  ;;  %vm2138_vm1 = vweird.f32 %v4381_v22 }
 0x443   : > { %v2092_v32 = vadd.f32 %v3412_v41, %v2091_v26  ;;  %v1867_v34 = vadd.f32 %v1866_v30, %v4362_v27  ;;  %v2106_v37 = vmul.f32 %v4379_v57, %v2105_v29  ;;  %v3125_v13 = vmul.f32 -1.442695, %v1913_v33 }
 0x444   : > { %v3418_v35 = vpop.eup %3417 }
 0x445   : > { %v3420_v39 = vpop.eup %3419  ;;  %v2096_v21 = vsel %vm2095_vm6, %v3412_v41, %v2092_v32  ;;  %v2119_v43 = vmul.f32 %v3418_v35, %v4376_v8  ;;  %v3126_v40 = vmul.f32 -1.442695, %v1867_v34  ;;  %v2107_v47 = vadd.f32 %v4379_v57, %v2106_v37 }
 0x446   : > { %v2101_v46 = vsel %vm2098_vm7, %v2100_v36, %v2096_v21  ;;  %v4405_v44 = vadd.f32 1.0, %v3420_v39  ;;  %v4407_v12 = vpop.eup %3421  ;;  %3425 = vpow2.f32 %v3125_v13  ;;  %vm2124_vm10 = vweird.f32 %v3418_v35 }
 0x447   : > { %v2553_v61 = vpack.c.bf16 %v2101_v46, %v2086_v42  ;;  %v2120_v48 = vsub.f32 1.0, %v2119_v43  ;;  %v3424_v49 = vpop.eup %3423  ;;  %v2134_v51 = vmul.f32 %v4407_v12, %v4381_v22  ;;  %v2111_v0 = vsel %vm4424_vm11, %v4379_v57, %v2107_v47  ;;  %vm2125_vm14 = vmor %vm2123_vm13, %vm2124_vm10 }
 0x448   : > { %3427 = vrcp.f32 %v4405_v44  ;;  %v1915_v52 = vpop.f32.mrf.mxu2  ;;  %v4432_v62 = vadd.f32 1.0, %v3424_v49  ;;  %v2142_v41 = vand.u32 2147483647, %v4381_v22  ;;  %v2116_v8 = vsel %vm4428_vm12, %v2115_v3, %v2111_v0 }
 0x449   : > { %2569 = vst [vmem:[%s4417_s24] sm:$0xff] %v2553_v61  ;;  %v2121_v53 = vmul.f32 %v3418_v35, %v2120_v48  ;;  %v2135_v60 = vsub.f32 1.0, %v2134_v51  ;;  %3429 = vpow2.f32 %v3126_v40  ;;  %v1916_v2 = vadd.f32 %v1915_v52, %v4365_v45 }
 0x44a   : > { %v1868_v63 = vpop.f32.mrf.mxu1  ;;  %3431 = vrcp.f32 %v4432_v62  ;;  %vm2139_vm0 = vweird.f32 %v4407_v12  ;;  %v2157_v20 = vand.u32 2147483647, %v4405_v44  ;;  %v2159_v11 = vand.u32 2147483648, %v4405_v44 }
 0x44b   : > { %v2122_v1 = vadd.f32 %v3418_v35, %v2121_v53  ;;  %v2136_v56 = vmul.f32 %v4407_v12, %v2135_v60  ;;  %v1869_v10 = vadd.f32 %v1868_v63, %v4362_v27  ;;  %v3127_v17 = vmul.f32 -1.442695, %v1916_v2  ;;  %vm4467_vm3 = vmor %vm2138_vm1, %vm2139_vm0 }
 0x44c   : > { %v3426_v6 = vpop.eup %3425  ;;  %vm4458_vm2 = vcmp.eq.f32.partialorder %v2142_v41, 8.507059e+37  ;;  %v2145_v32 = vor.u32 1.1754944e-38, %v2144_v19  ;;  %vm2153_vm5 = vweird.f32 %v4405_v44  ;;  %vm4477_vm6 = vcmp.eq.f32.partialorder %v2157_v20, 8.507059e+37 }
 0x44d   : > { %v2126_v55 = vsel %vm2125_vm14, %v3418_v35, %v2122_v1  ;;  %v4445_v16 = vadd.f32 1.0, %v3426_v6  ;;  %v2137_v15 = vadd.f32 %v4407_v12, %v2136_v56  ;;  %v3128_v25 = vmul.f32 -1.442695, %v1869_v10 }
 0x44e   : > { %v3428_v14 = vpop.eup %3427  ;;  %v2131_v5 = vsel %vm2128_vm15, %v2130_v4, %v2126_v55  ;;  %v2160_v38 = vor.u32 1.1754944e-38, %v2159_v11  ;;  %v2172_v21 = vand.u32 2147483647, %v4432_v62  ;;  %v2174_v43 = vand.u32 2147483648, %v4432_v62 }
 0x44f   : > { %v2554_v18 = vpack.c.bf16 %v2131_v5, %v2116_v8  ;;  %v2149_v57 = vmul.f32 %v3428_v14, %v4405_v44  ;;  %v3430_v58 = vpop.eup %3429  ;;  %3433 = vrcp.f32 %v4445_v16  ;;  %vm2154_vm4 = vweird.f32 %v3428_v14 }
 0x450   : > { %v1917_v23 = vpop.f32.mrf.mxu2  ;;  %v4456_v26 = vpop.eup %3431  ;;  %v4462_v28 = vadd.f32 1.0, %v3430_v58  ;;  %3435 = vpow2.f32 %v3127_v17  ;;  %v2141_v35 = vsel %vm4467_vm3, %v4407_v12, %v2137_v15  ;;  %vm2155_vm7 = vmor %vm2153_vm5, %vm2154_vm4  ;;  %v2187_v31 = vand.u32 2147483647, %v4445_v16 }
 0x451   : > { %2570 = vst [vmem:[%s4417_s24 + $0x8] sm:$0xff] %v2554_v18  ;;  %v2150_v24 = vsub.f32 1.0, %v2149_v57  ;;  %v1918_v29 = vadd.f32 %v1917_v23, %v4365_v45  ;;  %v2164_v34 = vmul.f32 %v4456_v26, %v4432_v62  ;;  %v2146_v44 = vsel %vm4458_vm2, %v2145_v32, %v2141_v35 }
 0x452   : > { %v1871_v30 = vpop.f32.mrf.mxu1  ;;  %3437 = vrcp.f32 %v4462_v28  ;;  %vm2169_vm8 = vweird.f32 %v4456_v26  ;;  %v2189_v59 = vand.u32 2147483648, %v4445_v16  ;;  %vm2168_vm9 = vweird.f32 %v4432_v62 }
 0x453   : > { %v2151_v33 = vmul.f32 %v3428_v14, %v2150_v24  ;;  %v2165_v39 = vsub.f32 1.0, %v2164_v34  ;;  %3439 = vpow2.f32 %v3128_v25  ;;  %v3129_v13 = vmul.f32 -1.442695, %v1918_v29  ;;  %vm4506_vm11 = vmor %vm2168_vm9, %vm2169_vm8 }
 0x454   : > { %v1872_v46 = vadd.f32 %v1871_v30, %v4362_v27  ;;  %vm4510_vm12 = vcmp.eq.f32.partialorder %v2172_v21, 8.507059e+37  ;;  %v2175_v56 = vor.u32 1.1754944e-38, %v2174_v43  ;;  %vm2183_vm13 = vweird.f32 %v4445_v16 }
 0x455   : > { %v2152_v37 = vadd.f32 %v3428_v14, %v2151_v33  ;;  %v3434_v42 = vpop.eup %3433  ;;  %v2166_v12 = vmul.f32 %v4456_v26, %v2165_v39  ;;  %3441 = vpow2.f32 %v3129_v13  ;;  %vm2188_vm15 = vcmp.eq.f32.partialorder %v2187_v31, 8.507059e+37 }
 0x456   : > { %v2179_v61 = vmul.f32 %v3434_v42, %v4445_v16  ;;  %v3436_v47 = vpop.eup %3435  ;;  %v3130_v49 = vmul.f32 -1.442695, %v1872_v46  ;;  %vm2184_vm10 = vweird.f32 %v3434_v42  ;;  %v2202_v8 = vand.u32 2147483647, %v4462_v28 }
 0x457   : > { %v2156_v40 = vsel %vm2155_vm7, %v3428_v14, %v2152_v37  ;;  %v2167_v51 = vadd.f32 %v4456_v26, %v2166_v12  ;;  %v4493_v53 = vadd.f32 1.0, %v3436_v47  ;;  %vm2185_vm14 = vmor %vm2183_vm13, %vm2184_vm10  ;;  %v2190_v14 = vor.u32 1.1754944e-38, %v2189_v59 }
 0x458   : > { %v2161_v48 = vsel %vm4477_vm6, %v2160_v38, %v2156_v40  ;;  %v1920_v50 = vpop.f32.mrf.mxu2  ;;  %v2180_v52 = vsub.f32 1.0, %v2179_v61  ;;  %v4495_v54 = vpop.eup %3437  ;;  %3443 = vpow2.f32 %v3130_v49  ;;  %v2204_v15 = vand.u32 2147483648, %v4462_v28 }
 0x459   : > { %v2555_v7 = vpack.c.bf16 %v2161_v48, %v2146_v44  ;;  %v1921_v60 = vadd.f32 %v1920_v50, %v4365_v45  ;;  %v3440_v0 = vpop.eup %3439  ;;  %v2194_v2 = vmul.f32 %v4495_v54, %v4462_v28  ;;  %3445 = vrcp.f32 %v4493_v53 }
 0x45a   : > { %v1873_v63 = vpop.f32.mrf.mxu1  ;;  %v2181_v1 = vmul.f32 %v3434_v42, %v2180_v52  ;;  %v2171_v62 = vsel %vm4506_vm11, %v4456_v26, %v2167_v51  ;;  %v4519_v41 = vadd.f32 1.0, %v3440_v0  ;;  %vm2199_vm0 = vweird.f32 %v4495_v54 }
 0x45b   : > { %2571 = vst [vmem:[%s4417_s24 + $0x10] sm:$0xff] %v2555_v7  ;;  %v2195_v55 = vsub.f32 1.0, %v2194_v2  ;;  %v3442_v10 = vpop.eup %3441  ;;  %v3131_v5 = vmul.f32 -1.442695, %v1921_v60  ;;  %v1874_v18 = vadd.f32 %v1873_v63, %v4362_v27  ;;  %v2176_v57 = vsel %vm4510_vm12, %v2175_v56, %v2171_v62 }
 0x45c   : > { %v2182_v6 = vadd.f32 %v3434_v42, %v2181_v1  ;;  %3447 = vrcp.f32 %v4519_v41  ;;  %v4530_v11 = vadd.f32 1.0, %v3442_v10  ;;  %v2217_v9 = vand.u32 2147483647, %v4493_v53 }
 0x45d   : > { %v2196_v16 = vmul.f32 %v4495_v54, %v2195_v55  ;;  %v2219_v29 = vand.u32 2147483648, %v4493_v53  ;;  %3449 = vpow2.f32 %v3131_v5  ;;  %vm2198_vm1 = vweird.f32 %v4462_v28 }
 0x45e   : > { %v2186_v17 = vsel %vm2185_vm14, %v3434_v42, %v2182_v6  ;;  %v3444_v19 = vpop.eup %3443  ;;  %3451 = vrcp.f32 %v4530_v11  ;;  %v3132_v32 = vmul.f32 -1.442695, %v1874_v18  ;;  %vm4542_vm2 = vmor %vm2198_vm1, %vm2199_vm0  ;;  %vm4546_vm3 = vcmp.eq.f32.partialorder %v2202_v8, 8.507059e+37 }
 0x45f   : > { %v2191_v58 = vsel %vm2188_vm15, %v2190_v14, %v2186_v17  ;;  %v2197_v24 = vadd.f32 %v4495_v54, %v2196_v16  ;;  %v4532_v25 = vadd.f32 1.0, %v3444_v19  ;;  %v3446_v26 = vpop.eup %3445  ;;  %v2205_v35 = vor.u32 1.1754944e-38, %v2204_v15 }
 0x460   : > { %v1922_v20 = vpop.f32.mrf.mxu2  ;;  %v2556_v23 = vpack.c.bf16 %v2191_v58, %v2176_v57  ;;  %v2209_v22 = vmul.f32 %v3446_v26, %v4493_v53  ;;  %v2234_v36 = vand.u32 2147483648, %v4519_v41  ;;  %vm2213_vm4 = vweird.f32 %v4493_v53 }
 0x461   : > { %v2201_v28 = vsel %vm4542_vm2, %v4495_v54, %v2197_v24  ;;  %3453 = vrcp.f32 %v4532_v25  ;;  %vm4558_vm5 = vcmp.eq.f32.partialorder %v2217_v9, 8.507059e+37  ;;  %v2220_v42 = vor.u32 1.1754944e-38, %v2219_v29 }
 0x462   : > { %v1876_v30 = vpop.f32.mrf.mxu1  ;;  %2572 = vst [vmem:[%s4417_s24 + $0x18] sm:$0xff] %v2556_v23  ;;  %v4551_v37 = vpop.eup %3447  ;;  %v2210_v38 = vsub.f32 1.0, %v2209_v22  ;;  %v2232_v43 = vand.u32 2147483647, %v4519_v41  ;;  %vm2214_vm6 = vweird.f32 %v3446_v26  ;;  %vm2228_vm7 = vweird.f32 %v4519_v41 }
 0x463   : > { %v2224_v21 = vmul.f32 %v4551_v37, %v4519_v41  ;;  %3455 = vpow2.f32 %v3132_v32  ;;  %v3450_v46 = vpop.eup %3449  ;;  %v2206_v44 = vsel %vm4546_vm3, %v2205_v35, %v2201_v28  ;;  %v2235_v12 = vor.u32 1.1754944e-38, %v2234_v36  ;;  %vm2215_vm9 = vmor %vm2213_vm4, %vm2214_vm6 }
 0x464   : > { %v2211_v13 = vmul.f32 %v3446_v26, %v2210_v38  ;;  %v1923_v61 = vadd.f32 %v1922_v20, %v4365_v45  ;;  %v3452_v48 = vpop.eup %3451  ;;  %vm2243_vm8 = vweird.f32 %v4530_v11  ;;  %v2247_v50 = vand.u32 2147483647, %v4530_v11 }
 0x465   : > { %v2225_v40 = vsub.f32 1.0, %v2224_v21  ;;  %v4571_v7 = vadd.f32 1.0, %v3450_v46  ;;  %vm2229_vm10 = vweird.f32 %v4551_v37  ;;  %vm4577_vm11 = vcmp.eq.f32.partialorder %v2232_v43, 8.507059e+37 }
 0x466   : > { %v2212_v49 = vadd.f32 %v3446_v26, %v2211_v13  ;;  %v2239_v54 = vmul.f32 %v3452_v48, %v4530_v11  ;;  %v2249_v31 = vand.u32 2147483648, %v4530_v11  ;;  %vm2258_vm12 = vweird.f32 %v4532_v25  ;;  %vm4606_vm15 = vmor %vm2228_vm7, %vm2229_vm10 }
 0x467   : > { %v2226_v51 = vmul.f32 %v4551_v37, %v2225_v40  ;;  %v4583_v60 = vpop.eup %3453  ;;  %3457 = vrcp.f32 %v4571_v7  ;;  %v3133_v53 = vmul.f32 -1.442695, %v1923_v61  ;;  %v1877_v0 = vadd.f32 %v1876_v30, %v4362_v27 }
 0x468   : > { %v1925_v47 = vpop.f32.mrf.mxu2  ;;  %v2216_v63 = vsel %vm2215_vm9, %v3446_v26, %v2212_v49  ;;  %v2240_v3 = vsub.f32 1.0, %v2239_v54  ;;  %v2254_v4 = vmul.f32 %v4583_v60, %v4532_v25  ;;  %vm4593_vm13 = vcmp.eq.f32.partialorder %v2247_v50, 8.507059e+37 }
 0x469   : > { %v2221_v1 = vsel %vm4558_vm5, %v2220_v42, %v2216_v63  ;;  %v2227_v2 = vadd.f32 %v4551_v37, %v2226_v51  ;;  %v3456_v56 = vpop.eup %3455  ;;  %v2262_v55 = vand.u32 2147483647, %v4532_v25  ;;  %v1926_v10 = vadd.f32 %v1925_v47, %v4365_v45 }
 0x46a   : > { %v1878_v59 = vpop.f32.mrf.mxu1  ;;  %v2557_v62 = vpack.c.bf16 %v2221_v1, %v2206_v44  ;;  %v2241_v14 = vmul.f32 %v3452_v48, %v2240_v3  ;;  %vm2244_vm14 = vweird.f32 %v3452_v48  ;;  %v2255_v8 = vsub.f32 1.0, %v2254_v4 }
 0x46b   : > { %v4599_v5 = vadd.f32 1.0, %v3456_v56  ;;  %v2250_v16 = vor.u32 1.1754944e-38, %v2249_v31  ;;  %v2264_v18 = vand.u32 2147483648, %v4532_v25  ;;  %3459 = vpow2.f32 %v3133_v53  ;;  %vm2245_vm0 = vmor %vm2243_vm8, %vm2244_vm14 }
 0x46c   : > { %2573 = vst [vmem:[%s4417_s24 + $0x20] sm:$0xff] %v2557_v62  ;;  %v3134_v19 = vmul.f32 -1.442695, %v1877_v0  ;;  %v2231_v57 = vsel %vm4606_vm15, %v4551_v37, %v2227_v2  ;;  %v2242_v58 = vadd.f32 %v3452_v48, %v2241_v14  ;;  %v2256_v15 = vmul.f32 %v4583_v60, %v2255_v8 }
 0x46d   : > { %3461 = vrcp.f32 %v4599_v5  ;;  %v3458_v41 = vpop.eup %3457  ;;  %vm2259_vm1 = vweird.f32 %v4583_v60  ;;  %vm4620_vm2 = vcmp.eq.f32.partialorder %v2262_v55, 8.507059e+37  ;;  %v3135_v24 = vmul.f32 -1.442695, %v1926_v10 }
 0x46e   : > { %3463 = vpow2.f32 %v3134_v19  ;;  %v2246_v26 = vsel %vm2245_vm0, %v3452_v48, %v2242_v58  ;;  %v2257_v9 = vadd.f32 %v4583_v60, %v2256_v15  ;;  %v2269_v29 = vmul.f32 %v3458_v41, %v4571_v7  ;;  %vm4634_vm3 = vmor %vm2258_vm12, %vm2259_vm1 }
 0x46f   : > { %v2277_v30 = vand.u32 2147483647, %v4571_v7  ;;  %v2236_v11 = vsel %vm4577_vm11, %v2235_v12, %v2231_v57  ;;  %v2251_v32 = vsel %vm4593_vm13, %v2250_v16, %v2246_v26  ;;  %v2279_v33 = vand.u32 2147483648, %v4571_v7 }
 0x470   : > { %v1927_v20 = vpop.f32.mrf.mxu2  ;;  %3465 = vpow2.f32 %v3135_v24  ;;  %v2558_v34 = vpack.c.bf16 %v2251_v32, %v2236_v11  ;;  %v2265_v36 = vor.u32 1.1754944e-38, %v2264_v18  ;;  %v2270_v37 = vsub.f32 1.0, %v2269_v29 }
 0x471   : > { %v1879_v28 = vadd.f32 %v1878_v59, %v4362_v27  ;;  %v3460_v38 = vpop.eup %3459  ;;  %v2261_v39 = vsel %vm4634_vm3, %v4583_v60, %v2257_v9  ;;  %vm2273_vm4 = vweird.f32 %v4571_v7  ;;  %vm2274_vm5 = vweird.f32 %v3458_v41 }
 0x472   : > { %v1881_v22 = vpop.f32.mrf.mxu1  ;;  %v1928_v42 = vadd.f32 %v1927_v20, %v4365_v45  ;;  %2574 = vst [vmem:[%s4417_s24 + $0x28] sm:$0xff] %v2558_v34  ;;  %v2271_v25 = vmul.f32 %v3458_v41, %v2270_v37  ;;  %v4647_v43 = vadd.f32 1.0, %v3460_v38  ;;  %vm4650_vm6 = vcmp.eq.f32.partialorder %v2277_v30, 8.507059e+37  ;;  %vm2275_vm7 = vmor %vm2273_vm4, %vm2274_vm5 }
 0x473   : > { %v4644_v21 = vpop.eup %3461  ;;  %v3136_v13 = vmul.f32 -1.442695, %v1879_v28  ;;  %v1882_v46 = vadd.f32 %v1881_v22, %v4362_v27  ;;  %v2280_v12 = vor.u32 1.1754944e-38, %v2279_v33  ;;  %v2292_v49 = vand.u32 2147483647, %v4599_v5 }
 0x474   : > { %v3464_v44 = vpop.eup %3463  ;;  %v2284_v61 = vmul.f32 %v4644_v21, %v4599_v5  ;;  %v3137_v47 = vmul.f32 -1.442695, %v1928_v42  ;;  %v2272_v48 = vadd.f32 %v3458_v41, %v2271_v25  ;;  %v2294_v50 = vand.u32 2147483648, %v4599_v5 }
 0x475   : > { %3467 = vrcp.f32 %v4647_v43  ;;  %v2266_v54 = vsel %vm4620_vm2, %v2265_v36, %v2261_v39  ;;  %v4664_v59 = vadd.f32 1.0, %v3464_v44  ;;  %v3138_v53 = vmul.f32 -1.442695, %v1882_v46 }
 0x476   : > { %v3466_v52 = vpop.eup %3465  ;;  %v2285_v31 = vsub.f32 1.0, %v2284_v61  ;;  %3469 = vpow2.f32 %v3136_v13  ;;  %v2276_v60 = vsel %vm2275_vm7, %v3458_v41, %v2272_v48  ;;  %v2307_v3 = vand.u32 2147483647, %v4647_v43 }
 0x477   : > { %v4666_v63 = vadd.f32 1.0, %v3466_v52  ;;  %3471 = vpow2.f32 %v3137_v47  ;;  %v2281_v1 = vsel %vm4650_vm6, %v2280_v12, %v2276_v60  ;;  %v2309_v4 = vand.u32 2147483648, %v4647_v43 }
 0x478   : > { %v1930_v51 = vpop.f32.mrf.mxu2  ;;  %v2286_v2 = vmul.f32 %v4644_v21, %v2285_v31  ;;  %3473 = vrcp.f32 %v4664_v59  ;;  %v2559_v7 = vpack.c.bf16 %v2281_v1, %v2266_v54  ;;  %vm2289_vm8 = vweird.f32 %v4644_v21 }
 0x479   : > { %3475 = vrcp.f32 %v4666_v63  ;;  %vm2288_vm9 = vweird.f32 %v4599_v5  ;;  %vm4679_vm10 = vcmp.eq.f32.partialorder %v2292_v49, 8.507059e+37  ;;  %v2295_v55 = vor.u32 1.1754944e-38, %v2294_v50 }
 0x47a   : > { %v1883_v0 = vpop.f32.mrf.mxu1  ;;  %v2287_v56 = vadd.f32 %v4644_v21, %v2286_v2  ;;  %2575 = vst [vmem:[%s4417_s24 + $0x30] sm:$0xff] %v2559_v7  ;;  %3477 = vpow2.f32 %v3138_v53  ;;  %vm2303_vm11 = vweird.f32 %v4647_v43  ;;  %vm4685_vm12 = vcmp.eq.f32.partialorder %v2307_v3, 8.507059e+37  ;;  %vm4690_vm13 = vmor %vm2288_vm9, %vm2289_vm8 }
 0x47b   : > { %v3468_v62 = vpop.eup %3467  ;;  %v2324_v17 = vand.u32 2147483648, %v4664_v59  ;;  %v2310_v18 = vor.u32 1.1754944e-38, %v2309_v4  ;;  %v2322_v19 = vand.u32 2147483647, %v4664_v59  ;;  %v2337_v57 = vand.u32 2147483647, %v4666_v63 }
 0x47c   : > { %v3470_v10 = vpop.eup %3469  ;;  %v2299_v14 = vmul.f32 %v3468_v62, %v4647_v43  ;;  %v2291_v41 = vsel %vm4690_vm13, %v4644_v21, %v2287_v56  ;;  %v2339_v24 = vand.u32 2147483648, %v4666_v63  ;;  %vm2318_vm14 = vweird.f32 %v4664_v59 }
 0x47d   : > { %v3472_v16 = vpop.eup %3471  ;;  %v4696_v58 = vadd.f32 1.0, %v3470_v10  ;;  %vm2333_vm15 = vweird.f32 %v4666_v63  ;;  %vm2304_vm0 = vweird.f32 %v3468_v62  ;;  %v2325_v11 = vor.u32 1.1754944e-38, %v2324_v17 }
 0x47e   : > { %v4698_v20 = vpop.eup %3473  ;;  %v2300_v23 = vsub.f32 1.0, %v2299_v14  ;;  %v4704_v26 = vadd.f32 1.0, %v3472_v16  ;;  %v2296_v33 = vsel %vm4679_vm10, %v2295_v55, %v2291_v41  ;;  %vm4716_vm1 = vcmp.eq.f32.partialorder %v2322_v19, 8.507059e+37  ;;  %vm2305_vm3 = vmor %vm2303_vm11, %vm2304_vm0 }
 0x47f   : > { %v2314_v9 = vmul.f32 %v4698_v20, %v4664_v59  ;;  %3479 = vrcp.f32 %v4696_v58  ;;  %v3476_v30 = vpop.eup %3475  ;;  %vm4721_vm2 = vcmp.eq.f32.partialorder %v2337_v57, 8.507059e+37  ;;  %v1931_v28 = vadd.f32 %v1930_v51, %v4365_v45 }
 0x480   : > { %v1932_v15 = vpop.f32.mrf.mxu2  ;;  %v2301_v22 = vmul.f32 %v3468_v62, %v2300_v23  ;;  %3481 = vrcp.f32 %v4704_v26  ;;  %v3478_v32 = vpop.eup %3477  ;;  %v2329_v36 = vmul.f32 %v3476_v30, %v4666_v63  ;;  %v2340_v39 = vor.u32 1.1754944e-38, %v2339_v24 }
 0x481   : > { %v2315_v34 = vsub.f32 1.0, %v2314_v9  ;;  %v1884_v42 = vadd.f32 %v1883_v0, %v4362_v27  ;;  %v1933_v21 = vadd.f32 %v1932_v15, %v4365_v45  ;;  %vm2319_vm4 = vweird.f32 %v4698_v20 }
 0x482   : > { %v4711_v29 = vpop.f32.mrf.mxu1  ;;  %v2302_v38 = vadd.f32 %v3468_v62, %v2301_v22  ;;  %v2330_v13 = vsub.f32 1.0, %v2329_v36  ;;  %v4732_v46 = vadd.f32 1.0, %v3478_v32  ;;  %vm2334_vm5 = vweird.f32 %v3476_v30  ;;  %vm4744_vm7 = vmor %vm2318_vm14, %vm2319_vm4 }
 0x483   : > { %v2316_v25 = vmul.f32 %v4698_v20, %v2315_v34  ;;  %vm2348_vm6 = vweird.f32 %v4696_v58  ;;  %v2352_v40 = vand.u32 2147483647, %v4696_v58  ;;  %v2354_v12 = vand.u32 2147483648, %v4696_v58  ;;  %vm2335_vm9 = vmor %vm2333_vm15, %vm2334_vm5 }
 0x484   : > { %v2306_v44 = vsel %vm2305_vm3, %v3468_v62, %v2302_v38  ;;  %v2331_v48 = vmul.f32 %v3476_v30, %v2330_v13  ;;  %v3139_v49 = vmul.f32 -1.442695, %v1931_v28  ;;  %3483 = vrcp.f32 %v4732_v46 }
 0x485   : > { %v3480_v61 = vpop.eup %3479  ;;  %v2311_v43 = vsel %vm4685_vm12, %v2310_v18, %v2306_v44  ;;  %v2317_v47 = vadd.f32 %v4698_v20, %v2316_v25  ;;  %v3140_v60 = vmul.f32 -1.442695, %v1884_v42  ;;  %vm2363_vm8 = vweird.f32 %v4704_v26 }
 0x486   : > { %v3482_v51 = vpop.eup %3481  ;;  %v2560_v52 = vpack.c.bf16 %v2311_v43, %v2296_v33  ;;  %v2344_v31 = vmul.f32 %v3480_v61, %v4696_v58  ;;  %v2332_v0 = vadd.f32 %v3476_v30, %v2331_v48  ;;  %vm4759_vm10 = vcmp.eq.f32.partialorder %v2352_v40, 8.507059e+37 }
 0x487   : > { %v2321_v53 = vsel %vm4744_vm7, %v4698_v20, %v2317_v47  ;;  %v2359_v1 = vmul.f32 %v3482_v51, %v4704_v26  ;;  %v2367_v7 = vand.u32 2147483647, %v4704_v26  ;;  %v2369_v4 = vand.u32 2147483648, %v4704_v26 }
 0x488   : > { %v1935_v50 = vpop.f32.mrf.mxu2  ;;  %2576 = vst [vmem:[%s4417_s24 + $0x38] sm:$0xff] %v2560_v52  ;;  %v2345_v59 = vsub.f32 1.0, %v2344_v31  ;;  %v2336_v56 = vsel %vm2335_vm9, %v3476_v30, %v2332_v0  ;;  %vm2349_vm11 = vweird.f32 %v3480_v61  ;;  %3485 = vpow2.f32 %v3139_v49 }
 0x489   : > { %v2360_v62 = vsub.f32 1.0, %v2359_v1  ;;  %v2326_v6 = vsel %vm4716_vm1, %v2325_v11, %v2321_v53  ;;  %v2341_v63 = vsel %vm4721_vm2, %v2340_v39, %v2336_v56  ;;  %3487 = vpow2.f32 %v3140_v60  ;;  %vm2350_vm13 = vmor %vm2348_vm6, %vm2349_vm11 }
 0x48a   : > { %v1888_v2 = vpop.f32.mrf.mxu1  ;;  %v2346_v55 = vmul.f32 %v3480_v61, %v2345_v59  ;;  %v2561_v10 = vpack.c.bf16 %v2341_v63, %v2326_v6  ;;  %vm2364_vm12 = vweird.f32 %v3482_v51  ;;  %v3141_v8 = vmul.f32 -1.442695, %v1933_v21  ;;  %v4769_v17 = vpop.eup %3483 }
 0x48b   : > { %v2361_v14 = vmul.f32 %v3482_v51, %v2360_v62  ;;  %v2355_v5 = vor.u32 1.1754944e-38, %v2354_v12  ;;  %v1887_v18 = vadd.f32 %v4711_v29, %v4362_v27  ;;  %v1936_v19 = vadd.f32 %v1935_v50, %v4365_v45  ;;  %vm2365_vm15 = vmor %vm2363_vm8, %vm2364_vm12 }
 0x48c   : > { %v2347_v16 = vadd.f32 %v3480_v61, %v2346_v55  ;;  %2577 = vst [vmem:[%s4417_s24 + $0x40] sm:$0xff] %v2561_v10  ;;  %vm2368_vm14 = vcmp.eq.f32.partialorder %v2367_v7, 8.507059e+37  ;;  %v2374_v15 = vmul.f32 %v4769_v17, %v4732_v46  ;;  %3489 = vpow2.f32 %v3141_v8 }
 0x48d   : > { %v2362_v57 = vadd.f32 %v3482_v51, %v2361_v14  ;;  %v2370_v23 = vor.u32 1.1754944e-38, %v2369_v4  ;;  %v3142_v24 = vmul.f32 -1.442695, %v1887_v18  ;;  %v3143_v9 = vmul.f32 -1.442695, %v1936_v19 }
 0x48e   : > { %v2351_v41 = vsel %vm2350_vm13, %v3480_v61, %v2347_v16  ;;  %v3486_v29 = vpop.eup %3485  ;;  %v2375_v22 = vsub.f32 1.0, %v2374_v15  ;;  %v1889_v11 = vadd.f32 %v1888_v2, %v4362_v27  ;;  %v2382_v38 = vand.u32 2147483647, %v4732_v46 }
 0x48f   : > { %v2356_v58 = vsel %vm4759_vm10, %v2355_v5, %v2351_v41  ;;  %v2366_v30 = vsel %vm2365_vm15, %v3482_v51, %v2362_v57  ;;  %v3488_v32 = vpop.eup %3487  ;;  %v4786_v34 = vadd.f32 1.0, %v3486_v29  ;;  %3491 = vpow2.f32 %v3142_v24 }
 0x490   : > { %v1937_v20 = vpop.f32.mrf.mxu2  ;;  %v2371_v33 = vsel %vm2368_vm14, %v2370_v23, %v2366_v30  ;;  %v2376_v37 = vmul.f32 %v4769_v17, %v2375_v22  ;;  %v4790_v28 = vadd.f32 1.0, %v3488_v32  ;;  %3493 = vpow2.f32 %v3143_v9 }
 0x491   : > { %v1938_v26 = vadd.f32 %v1937_v20, %v4365_v45  ;;  %v2562_v36 = vpack.c.bf16 %v2371_v33, %v2356_v58  ;;  %v2384_v39 = vand.u32 2147483648, %v4732_v46  ;;  %3495 = vrcp.f32 %v4786_v34 }
 0x492   : > { %v1891_v35 = vpop.f32.mrf.mxu1  ;;  %v3490_v42 = vpop.eup %3489  ;;  %3497 = vrcp.f32 %v4790_v28  ;;  %v3144_v21 = vmul.f32 -1.442695, %v1889_v11  ;;  %v2377_v25 = vadd.f32 %v4769_v17, %v2376_v37  ;;  %vm2379_vm0 = vweird.f32 %v4769_v17 }
 0x493   : > { %2578 = vst [vmem:[%s4417_s24 + $0x48] sm:$0xff] %v2562_v36  ;;  %v4799_v13 = vadd.f32 1.0, %v3490_v42  ;;  %v2397_v44 = vand.u32 2147483647, %v4786_v34  ;;  %v2399_v40 = vand.u32 2147483648, %v4786_v34  ;;  %vm2378_vm1 = vweird.f32 %v4732_v46 }
 0x494   : > { %v3145_v12 = vmul.f32 -1.442695, %v1938_v26  ;;  %vm4804_vm2 = vcmp.eq.f32.partialorder %v2382_v38, 8.507059e+37  ;;  %v2385_v47 = vor.u32 1.1754944e-38, %v2384_v39  ;;  %vm4809_vm3 = vmor %vm2378_vm1, %vm2379_vm0  ;;  %v2414_v50 = vand.u32 2147483648, %v4790_v28 }
 0x495   : > { %v3492_v61 = vpop.eup %3491  ;;  %3499 = vrcp.f32 %v4799_v13  ;;  %v1892_v52 = vadd.f32 %v1891_v35, %v4362_v27  ;;  %v2381_v54 = vsel %vm4809_vm3, %v4769_v17, %v2377_v25  ;;  %vm2393_vm4 = vweird.f32 %v4786_v34 }
 0x496   : > { %v3494_v48 = vpop.eup %3493  ;;  %v4814_v51 = vadd.f32 1.0, %v3492_v61  ;;  %3501 = vpow2.f32 %v3144_v21  ;;  %vm4826_vm5 = vcmp.eq.f32.partialorder %v2397_v44, 8.507059e+37  ;;  %v2400_v1 = vor.u32 1.1754944e-38, %v2399_v40 }
 0x497   : > { %v3496_v46 = vpop.eup %3495  ;;  %v4821_v31 = vadd.f32 1.0, %v3494_v48  ;;  %3503 = vpow2.f32 %v3145_v12  ;;  %vm2408_vm6 = vweird.f32 %v4790_v28  ;;  %v2412_v2 = vand.u32 2147483647, %v4790_v28 }
 0x498   : > { %v4823_v60 = vpop.eup %3497  ;;  %v2389_v53 = vmul.f32 %v3496_v46, %v4786_v34  ;;  %v1940_v59 = vpop.f32.mrf.mxu2  ;;  %v2427_v7 = vand.u32 2147483647, %v4799_v13  ;;  %v2429_v4 = vand.u32 2147483648, %v4799_v13  ;;  %3505 = vrcp.f32 %v4814_v51 }
 0x499   : > { %v2404_v3 = vmul.f32 %v4823_v60, %v4790_v28  ;;  %v2386_v62 = vsel %vm4804_vm2, %v2385_v47, %v2381_v54  ;;  %v2415_v63 = vor.u32 1.1754944e-38, %v2414_v50  ;;  %3507 = vrcp.f32 %v4821_v31 }
 0x49a   : > { %v1893_v56 = vpop.f32.mrf.mxu1  ;;  %v2390_v6 = vsub.f32 1.0, %v2389_v53  ;;  %vm2423_vm7 = vweird.f32 %v4799_v13  ;;  %v3146_v14 = vmul.f32 -1.442695, %v1892_v52  ;;  %v1941_v8 = vadd.f32 %v1940_v59, %v4365_v45 }
 0x49b   : > { %v3500_v55 = vpop.eup %3499  ;;  %v2405_v10 = vsub.f32 1.0, %v2404_v3  ;;  %vm2394_vm8 = vweird.f32 %v3496_v46  ;;  %vm4842_vm9 = vcmp.eq.f32.partialorder %v2412_v2, 8.507059e+37  ;;  %v1894_v19 = vadd.f32 %v1893_v56, %v4362_v27 }
 0x49c   : > { %v3502_v17 = vpop.eup %3501  ;;  %v2391_v16 = vmul.f32 %v3496_v46, %v2390_v6  ;;  %v2419_v18 = vmul.f32 %v3500_v55, %v4799_v13  ;;  %vm2409_vm10 = vweird.f32 %v4823_v60  ;;  %vm4850_vm11 = vcmp.eq.f32.partialorder %v2427_v7, 8.507059e+37  ;;  %vm2395_vm12 = vmor %vm2393_vm4, %vm2394_vm8 }
 0x49d   : > { %v3504_v57 = vpop.eup %3503  ;;  %v2406_v15 = vmul.f32 %v4823_v60, %v2405_v10  ;;  %v2430_v41 = vor.u32 1.1754944e-38, %v2429_v4  ;;  %v2442_v9 = vand.u32 2147483647, %v4814_v51  ;;  %v2444_v29 = vand.u32 2147483648, %v4814_v51  ;;  %vm4870_vm14 = vmor %vm2408_vm6, %vm2409_vm10 }
 0x49e   : > { %v2392_v23 = vadd.f32 %v3496_v46, %v2391_v16  ;;  %v2420_v24 = vsub.f32 1.0, %v2419_v18  ;;  %v3506_v58 = vpop.eup %3505  ;;  %vm2424_vm13 = vweird.f32 %v3500_v55  ;;  %v4859_v30 = vadd.f32 1.0, %v3502_v17 }
 0x49f   : > { %v2407_v27 = vadd.f32 %v4823_v60, %v2406_v15  ;;  %3509 = vpow2.f32 %v3146_v14  ;;  %v3508_v22 = vpop.eup %3507  ;;  %v2434_v33 = vmul.f32 %v3506_v58, %v4814_v51  ;;  %v4862_v26 = vadd.f32 1.0, %v3504_v57  ;;  %vm2425_vm15 = vmor %vm2423_vm7, %vm2424_vm13 }
 0x4a0   : > { %v2396_v11 = vsel %vm2395_vm12, %v3496_v46, %v2392_v23  ;;  %v2421_v32 = vmul.f32 %v3500_v55, %v2420_v24  ;;  %v2449_v36 = vmul.f32 %v3508_v22, %v4821_v31  ;;  %v2457_v37 = vand.u32 2147483647, %v4821_v31  ;;  %v1942_v49 = vpop.f32.mrf.mxu2 }
 0x4a1   : > { %v2401_v35 = vsel %vm4826_vm5, %v2400_v1, %v2396_v11  ;;  %v2459_v38 = vand.u32 2147483648, %v4821_v31  ;;  %v2411_v42 = vsel %vm4870_vm14, %v4823_v60, %v2407_v27  ;;  %v2435_v25 = vsub.f32 1.0, %v2434_v33 }
 0x4a2   : > { %v2563_v39 = vpack.c.bf16 %v2401_v35, %v2386_v62  ;;  %v2422_v21 = vadd.f32 %v3500_v55, %v2421_v32  ;;  %v2450_v28 = vsub.f32 1.0, %v2449_v36  ;;  %3511 = vrcp.f32 %v4859_v30 }
 0x4a3   : > { %v3147_v44 = vmul.f32 -1.442695, %v1941_v8  ;;  %v3148_v40 = vmul.f32 -1.442695, %v1894_v19  ;;  %v2436_v61 = vmul.f32 %v3506_v58, %v2435_v25  ;;  %vm2439_vm0 = vweird.f32 %v3506_v58 }
 0x4a4   : > { %2579 = vst [vmem:[%s4417_s24 + $0x50] sm:$0xff] %v2563_v39  ;;  %v2426_v12 = vsel %vm2425_vm15, %v3500_v55, %v2422_v21  ;;  %3513 = vrcp.f32 %v4862_v26  ;;  %v2416_v47 = vsel %vm4842_vm9, %v2415_v63, %v2411_v42  ;;  %v2451_v48 = vmul.f32 %v3508_v22, %v2450_v28 }
 0x4a5   : > { %v3510_v43 = vpop.eup %3509  ;;  %v2431_v13 = vsel %vm4850_vm11, %v2430_v41, %v2426_v12  ;;  %vm2454_vm1 = vweird.f32 %v3508_v22  ;;  %v2437_v52 = vadd.f32 %v3506_v58, %v2436_v61  ;;  %vm2438_vm2 = vweird.f32 %v4814_v51 }
 0x4a6   : > { %v2564_v50 = vpack.c.bf16 %v2431_v13, %v2416_v47  ;;  %vm2453_vm3 = vweird.f32 %v4821_v31  ;;  %vm4892_vm4 = vmor %vm2438_vm2, %vm2439_vm0  ;;  %v2445_v54 = vor.u32 1.1754944e-38, %v2444_v29  ;;  %v2452_v60 = vadd.f32 %v3508_v22, %v2451_v48 }
 0x4a7   : > { %v4896_v53 = vadd.f32 1.0, %v3510_v43  ;;  %3515 = vpow2.f32 %v3147_v44  ;;  %v2441_v0 = vsel %vm4892_vm4, %v3506_v58, %v2437_v52  ;;  %vm2455_vm5 = vmor %vm2453_vm3, %vm2454_vm1  ;;  %v2460_v1 = vor.u32 1.1754944e-38, %v2459_v38 }
 0x4a8   : > { %2580 = vst [vmem:[%s4417_s24 + $0x58] sm:$0xff] %v2564_v50  ;;  %3517 = vpow2.f32 %v3148_v40  ;;  %v1943_v51 = vadd.f32 %v1942_v49, %v4365_v45  ;;  %v3512_v31 = vpop.eup %3511  ;;  %vm2443_vm6 = vcmp.eq.f32.partialorder %v2442_v9, 8.507059e+37  ;;  %v2456_v2 = vsel %vm2455_vm5, %v3508_v22, %v2452_v60 }
 0x4a9   : > { %vm2458_vm7 = vcmp.eq.f32.partialorder %v2457_v37, 8.507059e+37  ;;  %3519 = vrcp.f32 %v4896_v53  ;;  %v2446_v3 = vsel %vm2443_vm6, %v2445_v54, %v2441_v0  ;;  %v2464_v4 = vmul.f32 %v3512_v31, %v4859_v30 }
 0x4aa   : > { %v3514_v59 = vpop.eup %3513  ;;  %v2461_v7 = vsel %vm2458_vm7, %v2460_v1, %v2456_v2  ;;  %v3149_v63 = vmul.f32 -1.442695, %v1943_v51  ;;  %v2472_v45 = vand.u32 2147483647, %v4859_v30  ;;  %v2474_v10 = vand.u32 2147483648, %v4859_v30 }
 0x4ab   : > { %v2565_v56 = vpack.c.bf16 %v2461_v7, %v2446_v3  ;;  %v2479_v62 = vmul.f32 %v3514_v59, %v4862_v26  ;;  %v2465_v6 = vsub.f32 1.0, %v2464_v4  ;;  %v2489_v8 = vand.u32 2147483648, %v4862_v26 }
 0x4ac   : > { %vm2469_vm8 = vweird.f32 %v3512_v31  ;;  %3521 = vpow2.f32 %v3149_v63  ;;  %vm2484_vm9 = vweird.f32 %v3514_v59  ;;  %v2487_v57 = vand.u32 2147483647, %v4862_v26 }
 0x4ad   : > { %v3516_v55 = vpop.eup %3515  ;;  %2581 = vst [vmem:[%s4417_s24 + $0x60] sm:$0xff] %v2565_v56  ;;  %v2480_v14 = vsub.f32 1.0, %v2479_v62  ;;  %v2466_v16 = vmul.f32 %v3512_v31, %v2465_v6  ;;  %vm2468_vm10 = vweird.f32 %v4859_v30  ;;  %v2475_v23 = vor.u32 1.1754944e-38, %v2474_v10 }
 0x4ae   : > { %v3518_v17 = vpop.eup %3517  ;;  %v2070_v5 = vadd.f32 1.0, %v3516_v55  ;;  %vm2470_vm11 = vmor %vm2468_vm10, %vm2469_vm8  ;;  %vm2483_vm12 = vweird.f32 %v4862_v26  ;;  %v2490_v29 = vor.u32 1.1754944e-38, %v2489_v8  ;;  %vm2473_vm14 = vcmp.eq.f32.partialorder %v2472_v45, 8.507059e+37 }
 0x4af   : > { %v3520_v18 = vpop.eup %3519  ;;  %v2481_v19 = vmul.f32 %v3514_v59, %v2480_v14  ;;  %v4910_v15 = vadd.f32 1.0, %v3518_v17  ;;  %v2467_v20 = vadd.f32 %v3512_v31, %v2466_v16  ;;  %vm2485_vm13 = vmor %vm2483_vm12, %vm2484_vm9  ;;  %vm2488_vm15 = vcmp.eq.f32.partialorder %v2487_v57, 8.507059e+37 }
 0x4b0   : > { %v2494_v41 = vmul.f32 %v3520_v18, %v4896_v53  ;;  %3523 = vrcp.f32 %v2070_v5  ;;  %vm2499_vm0 = vweird.f32 %v3520_v18  ;;  %v2504_v38 = vand.u32 2147483648, %v4896_v53 }
 0x4b1   : > { %v2482_v24 = vadd.f32 %v3514_v59, %v2481_v19  ;;  %v2471_v9 = vsel %vm2470_vm11, %v3512_v31, %v2467_v20  ;;  %3525 = vrcp.f32 %v4910_v15  ;;  %vm2498_vm1 = vweird.f32 %v4896_v53 }
 0x4b2   : > { %v2495_v58 = vsub.f32 1.0, %v2494_v41  ;;  %v3522_v22 = vpop.eup %3521  ;;  %v2476_v30 = vsel %vm2473_vm14, %v2475_v23, %v2471_v9  ;;  %v2502_v21 = vand.u32 2147483647, %v4896_v53  ;;  %v2519_v25 = vand.u32 2147483648, %v2070_v5  ;;  %vm4921_vm2 = vmor %vm2498_vm1, %vm2499_vm0 }
 0x4b3   : > { %v2486_v27 = vsel %vm2485_vm13, %v3514_v59, %v2482_v24  ;;  %v2072_v35 = vadd.f32 1.0, %v3522_v22  ;;  %v2517_v40 = vand.u32 2147483647, %v2070_v5  ;;  %v2505_v47 = vor.u32 1.1754944e-38, %v2504_v38 }
 0x4b4   : > { %v2491_v11 = vsel %vm2488_vm15, %v2490_v29, %v2486_v27  ;;  %v2496_v32 = vmul.f32 %v3520_v18, %v2495_v58  ;;  %vm2513_vm4 = vweird.f32 %v2070_v5  ;;  %vm2503_vm5 = vcmp.eq.f32.partialorder %v2502_v21, 8.507059e+37 }
 0x4b5   : > { %v2566_v33 = vpack.c.bf16 %v2491_v11, %v2476_v30  ;;  %3527 = vrcp.f32 %v2072_v35  ;;  %v2520_v49 = vor.u32 1.1754944e-38, %v2519_v25  ;;  %vm2518_vm7 = vcmp.eq.f32.partialorder %v2517_v40, 8.507059e+37 }
 0x4b6   : > { %v3524_v34 = vpop.eup %3523  ;;  %v2497_v37 = vadd.f32 %v3520_v18, %v2496_v32  ;;  %vm2528_vm9 = vweird.f32 %v4910_v15  ;;  %v2534_v1 = vand.u32 2147483648, %v4910_v15  ;;  %v2549_v51 = vand.u32 2147483648, %v2072_v35 }
 0x4b7   : > { %2582 = vst [vmem:[%s4417_s24 + $0x68] sm:$0xff] %v2566_v33  ;;  %v2509_v36 = vmul.f32 %v3524_v34, %v2070_v5  ;;  %v3526_v26 = vpop.eup %3525  ;;  %vm2514_vm3 = vweird.f32 %v3524_v34  ;;  %v2532_v31 = vand.u32 2147483647, %v4910_v15  ;;  %v2547_v59 = vand.u32 2147483647, %v2072_v35 }
 0x4b8   : > { %v2524_v42 = vmul.f32 %v3526_v26, %v4910_v15  ;;  %v2501_v61 = vsel %vm4921_vm2, %v3520_v18, %v2497_v37  ;;  %vm2515_vm6 = vmor %vm2513_vm4, %vm2514_vm3  ;;  %vm2529_vm8 = vweird.f32 %v3526_v26  ;;  %vm2543_vm12 = vweird.f32 %v2072_v35 }
 0x4b9   : > { %v2510_v39 = vsub.f32 1.0, %v2509_v36  ;;  %v2506_v52 = vsel %vm2503_vm5, %v2505_v47, %v2501_v61  ;;  %vm2530_vm11 = vmor %vm2528_vm9, %vm2529_vm8  ;;  %v2535_v4 = vor.u32 1.1754944e-38, %v2534_v1  ;;  %v2550_v56 = vor.u32 1.1754944e-38, %v2549_v51 }
 0x4ba   : > { %v2525_v12 = vsub.f32 1.0, %v2524_v42  ;;  %vm2533_vm14 = vcmp.eq.f32.partialorder %v2532_v31, 8.507059e+37  ;;  %vm2548_vm15 = vcmp.eq.f32.partialorder %v2547_v59, 8.507059e+37 }
 0x4bb   : > { %v2511_v44 = vmul.f32 %v3524_v34, %v2510_v39  ;;  %v3528_v43 = vpop.eup %3527 }
 0x4bc   : > { %v2526_v48 = vmul.f32 %v3526_v26, %v2525_v12  ;;  %v2539_v50 = vmul.f32 %v3528_v43, %v2072_v35  ;;  %vm2544_vm10 = vweird.f32 %v3528_v43 }
 0x4bd   : > { %v2512_v13 = vadd.f32 %v3524_v34, %v2511_v44  ;;  %vm2545_vm13 = vmor %vm2543_vm12, %vm2544_vm10 }
 0x4be   : > { %v2527_v60 = vadd.f32 %v3526_v26, %v2526_v48  ;;  %v2540_v53 = vsub.f32 1.0, %v2539_v50 }
 0x4bf   : > { %v2516_v46 = vsel %vm2515_vm6, %v3524_v34, %v2512_v13 }
 0x4c0   : > { %v2521_v54 = vsel %vm2518_vm7, %v2520_v49, %v2516_v46  ;;  %v2541_v2 = vmul.f32 %v3528_v43, %v2540_v53  ;;  %v2531_v3 = vsel %vm2530_vm11, %v3526_v26, %v2527_v60 }
 0x4c1   : > { %v2567_v0 = vpack.c.bf16 %v2521_v54, %v2506_v52  ;;  %v2536_v6 = vsel %vm2533_vm14, %v2535_v4, %v2531_v3 }
 0x4c2   : > { %v2542_v7 = vadd.f32 %v3528_v43, %v2541_v2 }
 0x4c3   : > { %2583 = vst [vmem:[%s4417_s24 + $0x70] sm:$0xff] %v2567_v0 }
 0x4c4   : > { %v2546_v62 = vsel %vm2545_vm13, %v3528_v43, %v2542_v7 }
 0x4c5   : > { %v2551_v63 = vsel %vm2548_vm15, %v2550_v56, %v2546_v62 }
 0x4c6   : > { %v2568_v55 = vpack.c.bf16 %v2551_v63, %v2536_v6 }
 0x4c8   : > { %2584 = vst [vmem:[%s4417_s24 + $0x78] sm:$0xff] %v2568_v55 }
 0x4c9   : > { %3796 = shalt.err (!%p3793_p9)
}
 0x4ca   : > { %s3866_s18 = smov 128   ;;  %s3867_s24 = smov 8  }
 0x4cb   : > { %3302 = dma.vmem_to_hbm [thread:$0]  (%p4056_p0), %s2600_s15, 2048, %s2602_s19, %s2586_s29, %s3866_s18, %s3866_s18, %s3867_s24  }
 0x4cc PF: > { %s2616_s7 = sand.u32 1, %s3839_s25   ;;  %p5074_p10 = scmp.ge.s32.totalorder %s3851_s28, 2 }
 0x4cd   : > { %s2617_s9 = scalar_lea.sflag [#allocation4], %s2616_s7 }
 0x4ce   : > { %p3331_p11 = pnand %p5074_p10, %p4062_p6 }
 0x4d0   : > { %p3332_p12 = pneg %p3331_p11 }
 0x4d2   : > { %3834 = dma.done.wait (%p3332_p12), %s2617_s9, 2048  }
 0x4d3   : > { %3836 = vsyncadd (%p3332_p12), %s2617_s9, 4294965248  ;;  %p30_p2 = scmp.ge.s32.totalorder %s4032_s13, 4   ;;  %s5075_s25 = smov %s3843_s26 }
 0x4d4   : > { %s5076_s26 = smov %s3847_s27  ;;  %s5077_s27 = smov %s4044_s17 }
 0x4d5   : > { %s5078_s28 = smov %s4032_s13  ;;  %32 = sbr.rel (!%p30_p2) target bundleno = 18 (0x12), region = 145 }
 0x4da   :  { %2623 = vsyncpa [#allocation3], 1 }
 0x4db   :  { %2625 = vsyncpa [#allocation3 + $0x1], 1 }
 0x4dc   :  { %2626 = vsyncpa [#allocation6], 1 }
 0x4dd   :  { %2627 = vsyncpa [#allocation9], 1 }
 0x4de   :  { %2628 = vsyncpa [#allocation12], 1 }
 0x4df   :  { %2629 = vsyncpa [#allocation15], 1 }
 0x4e0   :  { %2630 = vsyncpa [#allocation4], 1 }
 0x4e1   :  { %2632 = vsyncpa [#allocation4 + $0x1], 1 }

</bundles_post_ra>
